<compile_context>
chip_gen: v7x
topology: tpu7x:2x2x1
jax: 0.10.0
libtpu: 0.0.40
codegen_flags: <defaults>
</compile_context>

<pallas_src>
import functools

import jax
import jax.numpy as jnp
from jax import lax
from jax.experimental import pallas as pl
from jax.experimental.pallas import tpu as pltpu


def _round_up(v, m):
    return (v + m - 1) // m * m


# ------------------------------ Pallas kernel ------------------------------ #

def _conv_gn_silu_kernel(x_ref, w_ref, b_ref, gid_ref, vmask_ref, gamma_ref,
                         beta_ref, o_ref, *, taps, l_out, groups, inv_cnt, eps,
                         act_norm):
    """Fused Conv2d (+bias) [+ GroupNorm + SiLU] for one batch sample.

    x_ref    : (1, S*S, Cin, L_in)  stride-phase-decomposed, flattened padded input
    w_ref    : (KH*KW, Cout, Cin)   per-tap weight matrices
    b_ref    : (Cout, 1)            conv bias
    gid_ref  : (Cout, 1)            group id per output channel (as float)
    vmask_ref: (1, L_out)           1.0 on valid output columns, 0.0 on pad columns
    gamma/beta_ref : (Cout, 1)      GroupNorm affine parameters
    o_ref    : (1, Cout, L_out)     output, NCHW-flattened (incl. Wp pad columns)
    """
    cout = o_ref.shape[1]

    # Load every needed stride-phase of the input once; all taps slice the
    # resident value (the "im2col" never exists in HBM).
    phase_vals = {}
    for ph, _ in taps:
        if ph not in phase_vals:
            phase_vals[ph] = x_ref[0, ph, :, :].astype(jnp.float32)   # (Cin, L_in)

    acc = jnp.zeros((cout, l_out), jnp.float32)
    for t, (ph, off) in enumerate(taps):
        slab = phase_vals[ph][:, off:off + l_out]                     # (Cin, L_out)
        acc = acc + jnp.dot(w_ref[t].astype(jnp.float32), slab,
                            preferred_element_type=jnp.float32)
    acc = acc + b_ref[...].astype(jnp.float32)                        # conv bias

    if act_norm:
        valid = vmask_ref[...]                                        # (1, L_out)
        gid = gid_ref[...]                                            # (Cout, 1)
        normed = jnp.zeros_like(acc)
        for g in range(groups):                                       # groups == 2
            sel = (gid == jnp.float32(g)).astype(jnp.float32)         # (Cout, 1)
            wgt = sel * valid                                         # (Cout, L_out)
            mean = jnp.sum(acc * wgt) * inv_cnt
            var = jnp.sum(jnp.square(acc - mean) * wgt) * inv_cnt     # biased (PyTorch GN)
            normed = normed + sel * ((acc - mean) * lax.rsqrt(var + eps))
        y = normed * gamma_ref[...].astype(jnp.float32) \
            + beta_ref[...].astype(jnp.float32)
        acc = y * jax.nn.sigmoid(y)                                   # SiLU

    o_ref[0] = acc.astype(o_ref.dtype)


# ------------------------------- layer wrapper ------------------------------ #

@functools.partial(jax.jit,
                   static_argnames=("stride", "padding", "act_norm", "groups", "eps"))
def conv_gn_silu(x, weight, bias, gamma, beta, *, stride, padding, act_norm,
                 groups=2, eps=1e-5):
    """Fused Conv2d(stride, padding, dilation=1) -> [GroupNorm(groups) -> SiLU].

    x: (N, Cin, H, W) NCHW.  Returns (N, Cout, Ho, Wo) NCHW.
    """
    n, cin, h, w = x.shape
    cout, _, kh, kw = weight.shape
    s, p = int(stride), int(padding)
    ho = (h + 2 * p - kh) // s + 1
    wo = (w + 2 * p - kw) // s + 1
    assert cout % groups == 0

    # Pad input channels to a sublane multiple (zero channels contribute nothing).
    cin_p = _round_up(max(cin, 8), 8)
    if cin_p != cin:
        x = jnp.pad(x, ((0, 0), (0, cin_p - cin), (0, 0), (0, 0)))
        weight = jnp.pad(weight, ((0, 0), (0, cin_p - cin), (0, 0), (0, 0)))

    # Zero-pad spatially, round up to the stride, and add one extra phase row at
    # the bottom so in-kernel tap windows never run past the flattened buffer.
    hp, wp = h + 2 * p, w + 2 * p
    hp_r, wp_r = _round_up(hp, s), _round_up(wp, s)
    hps, wps = hp_r // s + 1, wp_r // s
    xp = jnp.pad(x, ((0, 0), (0, 0),
                     (p, hp_r + s - h - p), (p, wp_r - w - p)))
    # Stride-phase decomposition -> (N, S*S, Cin, Hps*Wps), row-major per phase.
    xp = xp.reshape(n, cin_p, hps, s, wps, s).transpose(0, 3, 5, 1, 2, 4)
    xp = xp.reshape(n, s * s, cin_p, hps * wps)
    l_in = hps * wps
    l_out = ho * wps

    w_taps = weight.transpose(2, 3, 0, 1).reshape(kh * kw, cout, cin_p)
    b2 = bias.reshape(cout, 1).astype(jnp.float32)
    g2 = gamma.reshape(cout, 1).astype(jnp.float32)
    bt2 = beta.reshape(cout, 1).astype(jnp.float32)
    cg = cout // groups
    gid = (jnp.arange(cout, dtype=jnp.float32) // cg).reshape(cout, 1)
    vmask = (jnp.arange(l_out) % wps < wo).astype(jnp.float32).reshape(1, l_out)

    # Conv tap -> (stride-phase index, flat offset inside that phase).
    taps = tuple(((i % s) * s + (j % s), (i // s) * wps + (j // s))
                 for i in range(kh) for j in range(kw))

    # Explicit VMEM budget (double-buffered blocks) -- stay far below v7x 64 MiB.
    block_bytes = 4 * (s * s * cin_p * l_in + kh * kw * cout * cin_p
                       + cout * l_out + l_out + 4 * cout)
    if 2 * block_bytes > 24 * 1024 * 1024:
        # TODO(synk): tile the flattened spatial axis for very large feature maps
        # instead of processing one whole sample per grid step.
        raise ValueError("per-sample block exceeds the VMEM budget")

    kern = functools.partial(
        _conv_gn_silu_kernel, taps=taps, l_out=l_out, groups=groups,
        inv_cnt=1.0 / float(cg * ho * wo), eps=float(eps), act_norm=act_norm)

    out = pl.pallas_call(
        kern,
        out_shape=jax.ShapeDtypeStruct((n, cout, l_out), x.dtype),
        grid=(n,),
        in_specs=[
            pl.BlockSpec((1, s * s, cin_p, l_in), lambda b: (b, 0, 0, 0)),
            pl.BlockSpec((kh * kw, cout, cin_p), lambda b: (0, 0, 0)),
            pl.BlockSpec((cout, 1), lambda b: (0, 0)),
            pl.BlockSpec((cout, 1), lambda b: (0, 0)),
            pl.BlockSpec((1, l_out), lambda b: (0, 0)),
            pl.BlockSpec((cout, 1), lambda b: (0, 0)),
            pl.BlockSpec((cout, 1), lambda b: (0, 0)),
        ],
        out_specs=pl.BlockSpec((1, cout, l_out), lambda b: (b, 0, 0)),
        compiler_params=pltpu.CompilerParams(
            dimension_semantics=("parallel",),       # batch shards across TCs (v7x)
            vmem_limit_bytes=32 * 1024 * 1024),
    )(xp, w_taps, b2, gid, vmask, g2, bt2)

    # Drop the padded columns -> NCHW output, no transpose needed.
    return out.reshape(n, cout, ho, wps)[:, :, :, :wo]


# --------------------------------- modules ---------------------------------- #

def sampling_generator(N, reverse=False):
    samplings = [False, True] * (N // 2)
    if reverse:
        return list(reversed(samplings[:N]))
    return samplings[:N]


class BasicConv2d:
    """JAX/Pallas port of BasicConv2d: Conv2d [+ GroupNorm(2) + SiLU]."""

    def __init__(self, in_channels, out_channels, kernel_size=3, stride=1,
                 padding=0, dilation=1, upsampling=False, act_norm=False,
                 act_inplace=True, *, key):
        del act_inplace                      # in-place flag has no effect on the math
        assert dilation == 1, "Encoder never uses dilation > 1"
        # TODO(synk): upsampling (Conv -> PixelShuffle) branch is unused by Encoder.
        assert not upsampling, "upsampling path not implemented"
        self.stride, self.padding, self.act_norm = stride, padding, act_norm
        k = kernel_size
        fan_in = in_channels * k * k
        bound = float(fan_in) ** -0.5        # PyTorch kaiming_uniform(a=sqrt(5)) bound
        self.weight = jax.random.uniform(
            key, (out_channels, in_channels, k, k),
            minval=-bound, maxval=bound, dtype=jnp.float32)
        self.bias = jnp.zeros((out_channels,), jnp.float32)    # _init_weights: bias = 0
        self.gamma = jnp.ones((out_channels,), jnp.float32)    # GroupNorm affine init
        self.beta = jnp.zeros((out_channels,), jnp.float32)

    def __call__(self, x):
        return conv_gn_silu(x, self.weight, self.bias, self.gamma, self.beta,
                            stride=self.stride, padding=self.padding,
                            act_norm=self.act_norm)


class ConvSC:
    def __init__(self, C_in, C_out, kernel_size=3, downsampling=False,
                 upsampling=False, act_norm=True, act_inplace=True, *, key):
        stride = 2 if downsampling else 1
        padding = (kernel_size - stride + 1) // 2
        self.conv = BasicConv2d(C_in, C_out, kernel_size, stride=stride,
                                upsampling=upsampling, padding=padding,
                                act_norm=act_norm, act_inplace=act_inplace, key=key)

    def __call__(self, x):
        return self.conv(x)


class Encoder:
    """3D Encoder for SimVP (JAX/Pallas port)."""

    def __init__(self, C_in, C_hid, N_S, spatio_kernel, act_inplace=True, *, key):
        samplings = sampling_generator(N_S)
        keys = jax.random.split(key, len(samplings))
        layers = [ConvSC(C_in, C_hid, spatio_kernel, downsampling=samplings[0],
                         act_inplace=act_inplace, key=keys[0])]
        for s_, k_ in zip(samplings[1:], keys[1:]):
            layers.append(ConvSC(C_hid, C_hid, spatio_kernel, downsampling=s_,
                                 act_inplace=act_inplace, key=k_))
        self.enc = layers

    def __call__(self, x):
        enc1 = self.enc[0](x)
        latent = enc1
        for i in range(1, len(self.enc)):
            latent = self.enc[i](latent)
        return latent, enc1


# -------------------------------- reference --------------------------------- #

def _reference_layer(x, layer):
    y = lax.conv_general_dilated(
        x, layer.weight, (layer.stride, layer.stride),
        [(layer.padding, layer.padding)] * 2,
        dimension_numbers=("NCHW", "OIHW", "NCHW"))
    y = y + layer.bias[None, :, None, None]
    if layer.act_norm:
        n, c, h, w = y.shape
        g = 2
        yr = y.reshape(n, g, c // g, h * w)
        mean = yr.mean(axis=(2, 3), keepdims=True)
        var = yr.var(axis=(2, 3), keepdims=True)
        yn = (yr - mean) * lax.rsqrt(var + 1e-5)
        yn = yn.reshape(n, c, h, w) * layer.gamma[None, :, None, None] \
            + layer.beta[None, :, None, None]
        y = yn * jax.nn.sigmoid(yn)
    return y


def _reference_encoder(x, enc):
    layers = [cs.conv for cs in enc.enc]
    enc1 = _reference_layer(x, layers[0])
    latent = enc1
    for layer in layers[1:]:
        latent = _reference_layer(latent, layer)
    return latent, enc1


# ----------------------------------- main ------------------------------------ #

if __name__ == "__main__":
    key = jax.random.PRNGKey(0)
    kx, kenc = jax.random.split(key)

    N, C_in, H, W = 2, 4, 16, 16
    C_hid, N_S, spatio_kernel = 32, 2, 3

    x = jax.random.normal(kx, (N, C_in, H, W), dtype=jnp.float32)
    enc = Encoder(C_in, C_hid, N_S, spatio_kernel, key=kenc)

    latent, enc1 = enc(x)
    jax.block_until_ready((latent, enc1))

    latent_ref, enc1_ref = _reference_encoder(x, enc)
    assert latent.shape == latent_ref.shape, (latent.shape, latent_ref.shape)
    assert enc1.shape == enc1_ref.shape, (enc1.shape, enc1_ref.shape)
    err_latent = float(jnp.max(jnp.abs(latent - latent_ref)))
    err_enc1 = float(jnp.max(jnp.abs(enc1 - enc1_ref)))
    assert err_latent < 1e-3 and err_enc1 < 1e-3, (err_latent, err_enc1)

    print("KERNEL_OK")
</pallas_src>

<mosaic_0001>
module attributes {stable_mosaic.version = 11 : i64} {
  func.func @_conv_gn_silu_kernel(%arg0: i32, %arg1: memref<1x1x8x342xf32, #tpu.memory_space<vmem>>, %arg2: memref<9x32x8xf32, #tpu.memory_space<vmem>>, %arg3: memref<32x1xf32, #tpu.memory_space<vmem>>, %arg4: memref<32x1xf32, #tpu.memory_space<vmem>>, %arg5: memref<1x288xf32, #tpu.memory_space<vmem>>, %arg6: memref<32x1xf32, #tpu.memory_space<vmem>>, %arg7: memref<32x1xf32, #tpu.memory_space<vmem>>, %arg8: memref<1x32x288xf32, #tpu.memory_space<vmem>>) attributes {dimension_semantics = [#tpu.dimension_semantics<parallel>], iteration_bounds = array<i64: 2>, scalar_prefetch = 0 : i64, scratch_operands = 0 : i64, tpu.core_type = #tpu.core_type<tc>, window_params = [{transform_indices = @transform_0, window_bounds = array<i64: 1, 1, 8, 342>}, {pipeline_mode = #tpu.pipeline_mode<synchronous>, transform_indices = @transform_1, window_bounds = array<i64: 9, 32, 8>}, {pipeline_mode = #tpu.pipeline_mode<synchronous>, transform_indices = @transform_2, window_bounds = array<i64: 32, 1>}, {pipeline_mode = #tpu.pipeline_mode<synchronous>, transform_indices = @transform_3, window_bounds = array<i64: 32, 1>}, {pipeline_mode = #tpu.pipeline_mode<synchronous>, transform_indices = @transform_4, window_bounds = array<i64: 1, 288>}, {pipeline_mode = #tpu.pipeline_mode<synchronous>, transform_indices = @transform_5, window_bounds = array<i64: 32, 1>}, {pipeline_mode = #tpu.pipeline_mode<synchronous>, transform_indices = @transform_6, window_bounds = array<i64: 32, 1>}, {transform_indices = @transform_7, window_bounds = array<i64: 1, 32, 288>}]} {
    %c0 = arith.constant 0 : index
    %c0_0 = arith.constant 0 : index
    %c0_1 = arith.constant 0 : index
    %c0_2 = arith.constant 0 : index
    %0 = vector.load %arg1[%c0, %c0_0, %c0_1, %c0_2] : memref<1x1x8x342xf32, #tpu.memory_space<vmem>>, vector<1x1x8x342xf32>
    %1 = vector.shape_cast %0 : vector<1x1x8x342xf32> to vector<8x342xf32>
    %cst = arith.constant 0.000000e+00 : f32
    %2 = vector.broadcast %cst : f32 to vector<32x288xf32>
    %3 = vector.extract_strided_slice %1 {offsets = [0, 0], sizes = [8, 288], strides = [1, 1]} : vector<8x342xf32> to vector<8x288xf32>
    %c0_3 = arith.constant 0 : index
    %c0_4 = arith.constant 0 : index
    %c0_5 = arith.constant 0 : index
    %4 = vector.load %arg2[%c0_3, %c0_4, %c0_5] : memref<9x32x8xf32, #tpu.memory_space<vmem>>, vector<1x32x8xf32>
    %5 = vector.shape_cast %4 : vector<1x32x8xf32> to vector<32x8xf32>
    %cst_6 = arith.constant dense<0.000000e+00> : vector<32x288xf32>
    %6 = tpu.matmul %5, %3, %cst_6 {dimension_numbers = #tpu.dot_dimension_numbers<[1], [0], [0], [1], [0, 0, 1, 1], [], []>} : vector<32x8xf32>, vector<8x288xf32>, vector<32x288xf32> -> vector<32x288xf32>
    %7 = arith.addf %2, %6 : vector<32x288xf32>
    %8 = vector.extract_strided_slice %1 {offsets = [0, 1], sizes = [8, 288], strides = [1, 1]} : vector<8x342xf32> to vector<8x288xf32>
    %c1 = arith.constant 1 : index
    %c0_7 = arith.constant 0 : index
    %c0_8 = arith.constant 0 : index
    %9 = vector.load %arg2[%c1, %c0_7, %c0_8] : memref<9x32x8xf32, #tpu.memory_space<vmem>>, vector<1x32x8xf32>
    %10 = vector.shape_cast %9 : vector<1x32x8xf32> to vector<32x8xf32>
    %cst_9 = arith.constant dense<0.000000e+00> : vector<32x288xf32>
    %11 = tpu.matmul %10, %8, %cst_9 {dimension_numbers = #tpu.dot_dimension_numbers<[1], [0], [0], [1], [0, 0, 1, 1], [], []>} : vector<32x8xf32>, vector<8x288xf32>, vector<32x288xf32> -> vector<32x288xf32>
    %12 = arith.addf %7, %11 : vector<32x288xf32>
    %13 = vector.extract_strided_slice %1 {offsets = [0, 2], sizes = [8, 288], strides = [1, 1]} : vector<8x342xf32> to vector<8x288xf32>
    %c2 = arith.constant 2 : index
    %c0_10 = arith.constant 0 : index
    %c0_11 = arith.constant 0 : index
    %14 = vector.load %arg2[%c2, %c0_10, %c0_11] : memref<9x32x8xf32, #tpu.memory_space<vmem>>, vector<1x32x8xf32>
    %15 = vector.shape_cast %14 : vector<1x32x8xf32> to vector<32x8xf32>
    %cst_12 = arith.constant dense<0.000000e+00> : vector<32x288xf32>
    %16 = tpu.matmul %15, %13, %cst_12 {dimension_numbers = #tpu.dot_dimension_numbers<[1], [0], [0], [1], [0, 0, 1, 1], [], []>} : vector<32x8xf32>, vector<8x288xf32>, vector<32x288xf32> -> vector<32x288xf32>
    %17 = arith.addf %12, %16 : vector<32x288xf32>
    %18 = vector.extract_strided_slice %1 {offsets = [0, 18], sizes = [8, 288], strides = [1, 1]} : vector<8x342xf32> to vector<8x288xf32>
    %c3 = arith.constant 3 : index
    %c0_13 = arith.constant 0 : index
    %c0_14 = arith.constant 0 : index
    %19 = vector.load %arg2[%c3, %c0_13, %c0_14] : memref<9x32x8xf32, #tpu.memory_space<vmem>>, vector<1x32x8xf32>
    %20 = vector.shape_cast %19 : vector<1x32x8xf32> to vector<32x8xf32>
    %cst_15 = arith.constant dense<0.000000e+00> : vector<32x288xf32>
    %21 = tpu.matmul %20, %18, %cst_15 {dimension_numbers = #tpu.dot_dimension_numbers<[1], [0], [0], [1], [0, 0, 1, 1], [], []>} : vector<32x8xf32>, vector<8x288xf32>, vector<32x288xf32> -> vector<32x288xf32>
    %22 = arith.addf %17, %21 : vector<32x288xf32>
    %23 = vector.extract_strided_slice %1 {offsets = [0, 19], sizes = [8, 288], strides = [1, 1]} : vector<8x342xf32> to vector<8x288xf32>
    %c4 = arith.constant 4 : index
    %c0_16 = arith.constant 0 : index
    %c0_17 = arith.constant 0 : index
    %24 = vector.load %arg2[%c4, %c0_16, %c0_17] : memref<9x32x8xf32, #tpu.memory_space<vmem>>, vector<1x32x8xf32>
    %25 = vector.shape_cast %24 : vector<1x32x8xf32> to vector<32x8xf32>
    %cst_18 = arith.constant dense<0.000000e+00> : vector<32x288xf32>
    %26 = tpu.matmul %25, %23, %cst_18 {dimension_numbers = #tpu.dot_dimension_numbers<[1], [0], [0], [1], [0, 0, 1, 1], [], []>} : vector<32x8xf32>, vector<8x288xf32>, vector<32x288xf32> -> vector<32x288xf32>
    %27 = arith.addf %22, %26 : vector<32x288xf32>
    %28 = vector.extract_strided_slice %1 {offsets = [0, 20], sizes = [8, 288], strides = [1, 1]} : vector<8x342xf32> to vector<8x288xf32>
    %c5 = arith.constant 5 : index
    %c0_19 = arith.constant 0 : index
    %c0_20 = arith.constant 0 : index
    %29 = vector.load %arg2[%c5, %c0_19, %c0_20] : memref<9x32x8xf32, #tpu.memory_space<vmem>>, vector<1x32x8xf32>
    %30 = vector.shape_cast %29 : vector<1x32x8xf32> to vector<32x8xf32>
    %cst_21 = arith.constant dense<0.000000e+00> : vector<32x288xf32>
    %31 = tpu.matmul %30, %28, %cst_21 {dimension_numbers = #tpu.dot_dimension_numbers<[1], [0], [0], [1], [0, 0, 1, 1], [], []>} : vector<32x8xf32>, vector<8x288xf32>, vector<32x288xf32> -> vector<32x288xf32>
    %32 = arith.addf %27, %31 : vector<32x288xf32>
    %33 = vector.extract_strided_slice %1 {offsets = [0, 36], sizes = [8, 288], strides = [1, 1]} : vector<8x342xf32> to vector<8x288xf32>
    %c6 = arith.constant 6 : index
    %c0_22 = arith.constant 0 : index
    %c0_23 = arith.constant 0 : index
    %34 = vector.load %arg2[%c6, %c0_22, %c0_23] : memref<9x32x8xf32, #tpu.memory_space<vmem>>, vector<1x32x8xf32>
    %35 = vector.shape_cast %34 : vector<1x32x8xf32> to vector<32x8xf32>
    %cst_24 = arith.constant dense<0.000000e+00> : vector<32x288xf32>
    %36 = tpu.matmul %35, %33, %cst_24 {dimension_numbers = #tpu.dot_dimension_numbers<[1], [0], [0], [1], [0, 0, 1, 1], [], []>} : vector<32x8xf32>, vector<8x288xf32>, vector<32x288xf32> -> vector<32x288xf32>
    %37 = arith.addf %32, %36 : vector<32x288xf32>
    %38 = vector.extract_strided_slice %1 {offsets = [0, 37], sizes = [8, 288], strides = [1, 1]} : vector<8x342xf32> to vector<8x288xf32>
    %c7 = arith.constant 7 : index
    %c0_25 = arith.constant 0 : index
    %c0_26 = arith.constant 0 : index
    %39 = vector.load %arg2[%c7, %c0_25, %c0_26] : memref<9x32x8xf32, #tpu.memory_space<vmem>>, vector<1x32x8xf32>
    %40 = vector.shape_cast %39 : vector<1x32x8xf32> to vector<32x8xf32>
    %cst_27 = arith.constant dense<0.000000e+00> : vector<32x288xf32>
    %41 = tpu.matmul %40, %38, %cst_27 {dimension_numbers = #tpu.dot_dimension_numbers<[1], [0], [0], [1], [0, 0, 1, 1], [], []>} : vector<32x8xf32>, vector<8x288xf32>, vector<32x288xf32> -> vector<32x288xf32>
    %42 = arith.addf %37, %41 : vector<32x288xf32>
    %43 = vector.extract_strided_slice %1 {offsets = [0, 38], sizes = [8, 288], strides = [1, 1]} : vector<8x342xf32> to vector<8x288xf32>
    %c8 = arith.constant 8 : index
    %c0_28 = arith.constant 0 : index
    %c0_29 = arith.constant 0 : index
    %44 = vector.load %arg2[%c8, %c0_28, %c0_29] : memref<9x32x8xf32, #tpu.memory_space<vmem>>, vector<1x32x8xf32>
    %45 = vector.shape_cast %44 : vector<1x32x8xf32> to vector<32x8xf32>
    %cst_30 = arith.constant dense<0.000000e+00> : vector<32x288xf32>
    %46 = tpu.matmul %45, %43, %cst_30 {dimension_numbers = #tpu.dot_dimension_numbers<[1], [0], [0], [1], [0, 0, 1, 1], [], []>} : vector<32x8xf32>, vector<8x288xf32>, vector<32x288xf32> -> vector<32x288xf32>
    %47 = arith.addf %42, %46 : vector<32x288xf32>
    %c0_31 = arith.constant 0 : index
    %c0_32 = arith.constant 0 : index
    %48 = vector.load %arg3[%c0_31, %c0_32] : memref<32x1xf32, #tpu.memory_space<vmem>>, vector<32x1xf32>
    %49 = vector.broadcast %48 : vector<32x1xf32> to vector<32x288xf32>
    %50 = arith.addf %47, %49 : vector<32x288xf32>
    %c0_33 = arith.constant 0 : index
    %c0_34 = arith.constant 0 : index
    %51 = vector.load %arg5[%c0_33, %c0_34] : memref<1x288xf32, #tpu.memory_space<vmem>>, vector<1x288xf32>
    %c0_35 = arith.constant 0 : index
    %c0_36 = arith.constant 0 : index
    %52 = vector.load %arg4[%c0_35, %c0_36] : memref<32x1xf32, #tpu.memory_space<vmem>>, vector<32x1xf32>
    %cst_37 = arith.constant 0.000000e+00 : f32
    %53 = vector.broadcast %cst_37 : f32 to vector<32x288xf32>
    %cst_38 = arith.constant 0.000000e+00 : f32
    %54 = vector.broadcast %cst_38 : f32 to vector<32x1xf32>
    %55 = arith.cmpf oeq, %52, %54 : vector<32x1xf32>
    %56 = arith.extui %55 : vector<32x1xi1> to vector<32x1xi32>
    %57 = arith.sitofp %56 : vector<32x1xi32> to vector<32x1xf32>
    %58 = vector.broadcast %57 : vector<32x1xf32> to vector<32x288xf32>
    %59 = vector.broadcast %51 : vector<1x288xf32> to vector<32x288xf32>
    %60 = arith.mulf %58, %59 : vector<32x288xf32>
    %61 = arith.mulf %50, %60 : vector<32x288xf32>
    %62 = vector.shape_cast %61 : vector<32x288xf32> to vector<1x32x288xf32>
    %cst_39 = arith.constant dense<0.000000e+00> : vector<1xf32>
    %63 = vector.multi_reduction <add>, %62, %cst_39 [1, 2] : vector<1x32x288xf32> to vector<1xf32>
    %64 = vector.shape_cast %63 : vector<1xf32> to vector<1x1x1xf32>
    %65 = vector.extract %64[0, 0, 0] : f32 from vector<1x1x1xf32>
    %cst_40 = arith.constant 2.44140625E-4 : f32
    %66 = arith.mulf %65, %cst_40 : f32
    %67 = vector.broadcast %66 : f32 to vector<32x288xf32>
    %68 = arith.subf %50, %67 : vector<32x288xf32>
    %69 = arith.mulf %68, %68 : vector<32x288xf32>
    %70 = arith.mulf %69, %60 : vector<32x288xf32>
    %71 = vector.shape_cast %70 : vector<32x288xf32> to vector<1x32x288xf32>
    %cst_41 = arith.constant dense<0.000000e+00> : vector<1xf32>
    %72 = vector.multi_reduction <add>, %71, %cst_41 [1, 2] : vector<1x32x288xf32> to vector<1xf32>
    %73 = vector.shape_cast %72 : vector<1xf32> to vector<1x1x1xf32>
    %74 = vector.extract %73[0, 0, 0] : f32 from vector<1x1x1xf32>
    %cst_42 = arith.constant 2.44140625E-4 : f32
    %75 = arith.mulf %74, %cst_42 : f32
    %76 = vector.broadcast %66 : f32 to vector<32x288xf32>
    %77 = arith.subf %50, %76 : vector<32x288xf32>
    %cst_43 = arith.constant 9.99999974E-6 : f32
    %78 = arith.addf %75, %cst_43 : f32
    %79 = math.rsqrt %78 : f32
    %80 = vector.broadcast %79 : f32 to vector<32x288xf32>
    %81 = arith.mulf %77, %80 : vector<32x288xf32>
    %82 = vector.broadcast %57 : vector<32x1xf32> to vector<32x288xf32>
    %83 = arith.mulf %82, %81 : vector<32x288xf32>
    %84 = arith.addf %53, %83 : vector<32x288xf32>
    %cst_44 = arith.constant 1.000000e+00 : f32
    %85 = vector.broadcast %cst_44 : f32 to vector<32x1xf32>
    %86 = arith.cmpf oeq, %52, %85 : vector<32x1xf32>
    %87 = arith.extui %86 : vector<32x1xi1> to vector<32x1xi32>
    %88 = arith.sitofp %87 : vector<32x1xi32> to vector<32x1xf32>
    %89 = vector.broadcast %88 : vector<32x1xf32> to vector<32x288xf32>
    %90 = vector.broadcast %51 : vector<1x288xf32> to vector<32x288xf32>
    %91 = arith.mulf %89, %90 : vector<32x288xf32>
    %92 = arith.mulf %50, %91 : vector<32x288xf32>
    %93 = vector.shape_cast %92 : vector<32x288xf32> to vector<1x32x288xf32>
    %cst_45 = arith.constant dense<0.000000e+00> : vector<1xf32>
    %94 = vector.multi_reduction <add>, %93, %cst_45 [1, 2] : vector<1x32x288xf32> to vector<1xf32>
    %95 = vector.shape_cast %94 : vector<1xf32> to vector<1x1x1xf32>
    %96 = vector.extract %95[0, 0, 0] : f32 from vector<1x1x1xf32>
    %cst_46 = arith.constant 2.44140625E-4 : f32
    %97 = arith.mulf %96, %cst_46 : f32
    %98 = vector.broadcast %97 : f32 to vector<32x288xf32>
    %99 = arith.subf %50, %98 : vector<32x288xf32>
    %100 = arith.mulf %99, %99 : vector<32x288xf32>
    %101 = arith.mulf %100, %91 : vector<32x288xf32>
    %102 = vector.shape_cast %101 : vector<32x288xf32> to vector<1x32x288xf32>
    %cst_47 = arith.constant dense<0.000000e+00> : vector<1xf32>
    %103 = vector.multi_reduction <add>, %102, %cst_47 [1, 2] : vector<1x32x288xf32> to vector<1xf32>
    %104 = vector.shape_cast %103 : vector<1xf32> to vector<1x1x1xf32>
    %105 = vector.extract %104[0, 0, 0] : f32 from vector<1x1x1xf32>
    %cst_48 = arith.constant 2.44140625E-4 : f32
    %106 = arith.mulf %105, %cst_48 : f32
    %107 = vector.broadcast %97 : f32 to vector<32x288xf32>
    %108 = arith.subf %50, %107 : vector<32x288xf32>
    %cst_49 = arith.constant 9.99999974E-6 : f32
    %109 = arith.addf %106, %cst_49 : f32
    %110 = math.rsqrt %109 : f32
    %111 = vector.broadcast %110 : f32 to vector<32x288xf32>
    %112 = arith.mulf %108, %111 : vector<32x288xf32>
    %113 = vector.broadcast %88 : vector<32x1xf32> to vector<32x288xf32>
    %114 = arith.mulf %113, %112 : vector<32x288xf32>
    %115 = arith.addf %84, %114 : vector<32x288xf32>
    %c0_50 = arith.constant 0 : index
    %c0_51 = arith.constant 0 : index
    %116 = vector.load %arg6[%c0_50, %c0_51] : memref<32x1xf32, #tpu.memory_space<vmem>>, vector<32x1xf32>
    %117 = vector.broadcast %116 : vector<32x1xf32> to vector<32x288xf32>
    %118 = arith.mulf %115, %117 : vector<32x288xf32>
    %c0_52 = arith.constant 0 : index
    %c0_53 = arith.constant 0 : index
    %119 = vector.load %arg7[%c0_52, %c0_53] : memref<32x1xf32, #tpu.memory_space<vmem>>, vector<32x1xf32>
    %120 = vector.broadcast %119 : vector<32x1xf32> to vector<32x288xf32>
    %121 = arith.addf %118, %120 : vector<32x288xf32>
    %122 = arith.negf %121 : vector<32x288xf32>
    %123 = math.exp %122 : vector<32x288xf32>
    %cst_54 = arith.constant 1.000000e+00 : f32
    %124 = vector.broadcast %cst_54 : f32 to vector<32x288xf32>
    %125 = arith.addf %124, %123 : vector<32x288xf32>
    %126 = arith.divf %124, %125 : vector<32x288xf32>
    %127 = arith.mulf %121, %126 : vector<32x288xf32>
    %c0_55 = arith.constant 0 : index
    %c0_56 = arith.constant 0 : index
    %c0_57 = arith.constant 0 : index
    %128 = vector.load %arg8[%c0_55, %c0_56, %c0_57] : memref<1x32x288xf32, #tpu.memory_space<vmem>>, vector<1x32x288xf32>
    %129 = vector.shape_cast %128 : vector<1x32x288xf32> to vector<32x288xf32>
    %130 = vector.shape_cast %127 : vector<32x288xf32> to vector<1x32x288xf32>
    tpu.vector_store %arg8[%c0_55, %c0_56, %c0_57], %130 {strides = array<i32>} : memref<1x32x288xf32, #tpu.memory_space<vmem>>, vector<1x32x288xf32>,
    return
  }
  func.func @transform_0(%arg0: i32) -> (i32, i32, i32, i32) {
    %c0_i32 = arith.constant 0 : i32
    %c0_i32_0 = arith.constant 0 : i32
    %c0_i32_1 = arith.constant 0 : i32
    %c0_i32_2 = arith.constant 0 : i32
    return %arg0, %c0_i32, %c0_i32_0, %c0_i32_1 : i32, i32, i32, i32
  }
  func.func @transform_1(%arg0: i32) -> (i32, i32, i32) {
    %c0_i32 = arith.constant 0 : i32
    %c0_i32_0 = arith.constant 0 : i32
    %c0_i32_1 = arith.constant 0 : i32
    %c0_i32_2 = arith.constant 0 : i32
    return %c0_i32, %c0_i32_0, %c0_i32_1 : i32, i32, i32
  }
  func.func @transform_2(%arg0: i32) -> (i32, i32) {
    %c0_i32 = arith.constant 0 : i32
    %c0_i32_0 = arith.constant 0 : i32
    %c0_i32_1 = arith.constant 0 : i32
    return %c0_i32, %c0_i32_0 : i32, i32
  }
  func.func @transform_3(%arg0: i32) -> (i32, i32) {
    %c0_i32 = arith.constant 0 : i32
    %c0_i32_0 = arith.constant 0 : i32
    %c0_i32_1 = arith.constant 0 : i32
    return %c0_i32, %c0_i32_0 : i32, i32
  }
  func.func @transform_4(%arg0: i32) -> (i32, i32) {
    %c0_i32 = arith.constant 0 : i32
    %c0_i32_0 = arith.constant 0 : i32
    %c0_i32_1 = arith.constant 0 : i32
    return %c0_i32, %c0_i32_0 : i32, i32
  }
  func.func @transform_5(%arg0: i32) -> (i32, i32) {
    %c0_i32 = arith.constant 0 : i32
    %c0_i32_0 = arith.constant 0 : i32
    %c0_i32_1 = arith.constant 0 : i32
    return %c0_i32, %c0_i32_0 : i32, i32
  }
  func.func @transform_6(%arg0: i32) -> (i32, i32) {
    %c0_i32 = arith.constant 0 : i32
    %c0_i32_0 = arith.constant 0 : i32
    %c0_i32_1 = arith.constant 0 : i32
    return %c0_i32, %c0_i32_0 : i32, i32
  }
  func.func @transform_7(%arg0: i32) -> (i32, i32, i32) {
    %c0_i32 = arith.constant 0 : i32
    %c0_i32_0 = arith.constant 0 : i32
    %c0_i32_1 = arith.constant 0 : i32
    return %arg0, %c0_i32, %c0_i32_0 : i32, i32, i32
  }
}

</mosaic_0001>

<bundles_post_ra>
// kernel: conv_gn_silu.1
= control target key start
LH: loop header
LB: loop body
LE: loop exit
PB: predicated region body
PF: predicated region fallthrough
CT: control target
= control target key end

     0   :  { %s3330_s24 = smov 0   ;;  %s4236_s0 = inlined_call_operand.vmem [shape: f32[2,1,8,342], index: 0, kind: input, shape index: {}]   ;;  %s4237_s1 = inlined_call_operand.vmem [shape: f32[9,32,8], index: 1, kind: input, shape index: {}]   ;;  %s4238_s2 = inlined_call_operand.vmem [shape: f32[32,1], index: 2, kind: input, shape index: {}]   ;;  %s4239_s3 = inlined_call_operand.vmem [shape: f32[32,1], index: 3, kind: input, shape index: {}]   ;;  %s4240_s4 = inlined_call_operand.vmem [shape: f32[1,288], index: 4, kind: input, shape index: {}]   ;;  %s4241_s5 = inlined_call_operand.vmem [shape: f32[32,1], index: 5, kind: input, shape index: {}]   ;;  %s4242_s6 = inlined_call_operand.vmem [shape: f32[32,1], index: 6, kind: input, shape index: {}]   ;;  %s4243_s7 = inlined_call_operand.vmem [shape: f32[2,32,288], index: 7, kind: output, shape index: {}]  }
   0x1 LB: > { %s2833_s25 = sadd.s32 4294967295, %s3278_s24   ;;  %p2837_p0 = scmp.ge.s32.totalorder %s3278_s24, 1  ;;  %s3278_s24 = sphi %s3330_s24, %s17_s24  }
   0x2   : > { %p237_p1 = scmp.lt.s32.totalorder %s3278_s24, 3 }
   0x4   : > { %p238_p2 = pnand %p2837_p0, %p237_p1 }
   0x6   : > { %241 = sbr.rel (%p238_p2) target bundleno = 1341 (0x53d), region = 48 }
   0xd   : > { %p269_p3 = scmp.lt.s32.totalorder %s2833_s25, 1  ;;  %v3280_v0 = vmov 0.0   ;;  %s3281_s30 = smov 127   ;;  %v2184_v4 = vld [vmem:[%s4238_s2] sm:$0xff]  ;;  %v2222_v5 = vld [vmem:[%s4239_s3 + $0x8] sm:$0xff]  ;;  %v3289_v6 = vmov 0  }
   0xe   : > { %383 = vmatprep.mubr.f32.mxu1 %v3280_v0  ;;  %772 = vmatprep.mubr.f32.mxu0 %v3280_v0  ;;  %s3282_s8 = smov 126   ;;  %s3283_s9 = smov 110   ;;  %vm2226_vm0 = vcmp.eq.f32.partialorder %v2222_v5, 0.0  ;;  %v2223_v7 = vld [vmem:[%s4239_s3 + $0x10] sm:$0xff]  ;;  %v2221_v8 = vld [vmem:[%s4239_s3] sm:$0xff]  ;;  %v2224_v11 = vld [vmem:[%s4239_s3 + $0x18] sm:$0xff] }
   0xf   : > { %s4253_s25 = smov (!%p269_p3, %s2833_s25), 1  ;;  %s3284_s10 = smov 109   ;;  %3213 = vset.pattern.permute.xlu0 %v3289_v6  ;;  %3214 = vset.pattern.permute.xlu1 %v3289_v6  ;;  %v2945_v9 = vsel %vm2226_vm0, 1.0, %v3280_v0  ;;  %vm2225_vm1 = vcmp.eq.f32.partialorder %v2221_v8, 0.0  ;;  %vm2227_vm2 = vcmp.eq.f32.partialorder %v2223_v7, 0.0  ;;  %v2185_v12 = vld [vmem:[%s4238_s2 + $0x8] sm:$0xff] }
  0x10   : > { %s3181_s26 = smul.u32 24, %s4253_s25  ;;  %s3285_s11 = smov 108   ;;  %v2944_v10 = vsel %vm2225_vm1, 1.0, %v3280_v0  ;;  %v2946_v13 = vsel %vm2227_vm2, 1.0, %v3280_v0  ;;  %vm2228_vm3 = vcmp.eq.f32.partialorder %v2224_v11, 0.0  ;;  %v2186_v14 = vld [vmem:[%s4238_s2 + $0x10] sm:$0xff] }
  0x11   : > { %s3286_s12 = smov 92   ;;  %s3287_s13 = smov 91   ;;  %v2947_v15 = vsel %vm2228_vm3, 1.0, %v3280_v0  ;;  %vm2426_vm4 = vcmp.eq.f32.partialorder %v2221_v8, 1.0  ;;  %v2187_v18 = vld [vmem:[%s4238_s2 + $0x18] sm:$0xff]  ;;  %vm300_vm5 = vcmask 1039360  }
  0x12   : > { %s273_s29 = scalar_lea.vmem %s4236_s0, %s3181_s26  ;;  %s3288_s14 = smov 90   ;;  %v2948_v19 = vsel %vm2426_vm4, 1.0, %v3280_v0  ;;  %vm306_vm6 = vcmask 64512   ;;  %v2840_v23 = vld [vmem:[%s4237_s1 + $0x20] sm:$0xff]  ;;  %vm2428_vm7 = vcmp.eq.f32.partialorder %v2223_v7, 1.0  ;;  %vm2429_vm8 = vcmp.eq.f32.partialorder %v2224_v11, 1.0 }
  0x13   : > { %v3346_v1 = vld [vmem:[%s273_s29 + $0x8] sm:$0xff]  ;;  %v3348_v2 = vld [vmem:[%s273_s29] sm:$0xff]  ;;  %v3352_v3 = vld [vmem:[%s273_s29 + $0x10] sm:$0xff]  ;;  %vm2427_vm9 = vcmp.eq.f32.partialorder %v2222_v5, 1.0  ;;  %vm690_vm10 = vcmask 1031168   ;;  %v2950_v28 = vsel %vm2428_vm7, 1.0, %v3280_v0 }
  0x14   : > { %296 = vrot.lane.b32.xlu0 %v3346_v1, %s3281_s30  ;;  %294 = vrot.lane.b32.xlu1 %v3348_v2, %s3281_s30  ;;  %v2949_v27 = vsel %vm2427_vm9, 1.0, %v3280_v0  ;;  %v2951_v29 = vsel %vm2429_vm8, 1.0, %v3280_v0  ;;  %v2841_v32 = vld [vmem:[%s4237_s1 + $0x28] sm:$0xff]  ;;  %v3426_v33 = vld [vmem:[%s4237_s1 + $0x40] sm:$0xff]  ;;  %vm905_vm11 = vcmask 900096   ;;  %vm1120_vm12 = vcmask 891904  }
  0x15   : > { %v3215_v34 = vpack.i.bf16 %v2951_v29, %v2950_v28  ;;  %v2842_v38 = vld [vmem:[%s4237_s1 + $0x30] sm:$0xff]  ;;  %v3446_v39 = vld [vmem:[%s4237_s1 + $0x48] sm:$0xff]  ;;  %v2843_v43 = vld [vmem:[%s4237_s1 + $0x38] sm:$0xff]  ;;  %vm1335_vm13 = vcmask 883712   ;;  %vm1550_vm14 = vcmask 752640   ;;  %vm1765_vm15 = vcmask 744448  }
  0x16   : > { %v3460_v44 = vld [vmem:[%s4237_s1 + $0x50] sm:$0xff]  ;;  %v3472_v47 = vld [vmem:[%s4237_s1 + $0x60] sm:$0xff]  ;;  %v3484_v52 = vld [vmem:[%s4237_s1 + $0x68] sm:$0xff]  ;;  %vm1980_vm0 = vcmask 736256   ;;  %vm2298_vm1 = vcmask 261120  }
  0x17   : > { %v282_v54 = vld [vmem:[%s4237_s1] sm:$0xff]  ;;  %v3502_v55 = vld [vmem:[%s4237_s1 + $0x70] sm:$0xff]  ;;  %v283_v57 = vld [vmem:[%s4237_s1 + $0x8] sm:$0xff] }
  0x18   : > { %298 = vrot.lane.b32.xlu0 %v3352_v3, %s3281_s30  ;;  %686 = vrot.lane.b32.xlu1 %v3346_v1, %s3282_s8  ;;  %v3515_v58 = vld [vmem:[%s4237_s1 + $0x78] sm:$0xff]  ;;  %v284_v60 = vld [vmem:[%s4237_s1 + $0x10] sm:$0xff]  ;;  %s3182_s30 = smul.u32 96, %s4253_s25 }
  0x19   : > { %v3532_v61 = vld [vmem:[%s4237_s1 + $0x80] sm:$0xff]  ;;  %v3568_v5 = vld [vmem:[%s4237_s1 + $0x98] sm:$0xff]  ;;  %v2921_v28 = vld [vmem:[%s4237_s1 + $0xe8] sm:$0xff] }
  0x1a   : > { %v2863_v7 = vld [vmem:[%s4237_s1 + $0x58] sm:$0xff]  ;;  %v2896_v8 = vld [vmem:[%s4237_s1 + $0xa0] sm:$0xff]  ;;  %v2922_v29 = vld [vmem:[%s4237_s1 + $0xf0] sm:$0xff] }
  0x1c   : > { %688 = vrot.lane.b32.xlu0 %v3352_v3, %s3282_s8  ;;  %684 = vrot.lane.b32.xlu1 %v3348_v2, %s3282_s8 }
  0x20   : > { %901 = vrot.lane.b32.xlu0 %v3346_v1, %s3283_s9  ;;  %903 = vrot.lane.b32.xlu1 %v3352_v3, %s3283_s9 }
  0x24   : > { %899 = vrot.lane.b32.xlu0 %v3348_v2, %s3283_s9  ;;  %1116 = vrot.lane.b32.xlu1 %v3346_v1, %s3284_s10 }
  0x28   : > { %1118 = vrot.lane.b32.xlu0 %v3352_v3, %s3284_s10  ;;  %1114 = vrot.lane.b32.xlu1 %v3348_v2, %s3284_s10 }
  0x2c   : > { %1331 = vrot.lane.b32.xlu0 %v3346_v1, %s3285_s11  ;;  %1333 = vrot.lane.b32.xlu1 %v3352_v3, %s3285_s11 }
  0x30   : > { %1329 = vrot.lane.b32.xlu0 %v3348_v2, %s3285_s11  ;;  %1546 = vrot.lane.b32.xlu1 %v3346_v1, %s3286_s12 }
  0x34   : > { %1548 = vrot.lane.b32.xlu0 %v3352_v3, %s3286_s12  ;;  %1544 = vrot.lane.b32.xlu1 %v3348_v2, %s3286_s12 }
  0x38   : > { %1761 = vrot.lane.b32.xlu0 %v3346_v1, %s3287_s13  ;;  %1763 = vrot.lane.b32.xlu1 %v3352_v3, %s3287_s13 }
  0x3c   : > { %1759 = vrot.lane.b32.xlu0 %v3348_v2, %s3287_s13  ;;  %1976 = vrot.lane.b32.xlu1 %v3346_v1, %s3288_s14 }
  0x40   : > { %1978 = vrot.lane.b32.xlu0 %v3352_v3, %s3288_s14  ;;  %1974 = vrot.lane.b32.xlu1 %v3348_v2, %s3288_s14 }
  0x44   : > { %2190 = vperm.xlu0 %3213, %v2184_v4   ;;  %2239 = vperm.xlu1 %3214, %v2944_v10   ;;  %v3558_v4 = vld [vmem:[%s4237_s1 + $0x90] sm:$0xff] }
  0x48   : > { %2244 = vperm.xlu0 %3213, %v2945_v9   ;;  %2195 = vperm.xlu1 %3214, %v2185_v12  }
  0x4c   : > { %2249 = vperm.xlu0 %3213, %v2946_v13   ;;  %2200 = vperm.xlu1 %3214, %v2186_v14   ;;  %v2897_v13 = vld [vmem:[%s4237_s1 + $0xa8] sm:$0xff]  ;;  %v2898_v14 = vld [vmem:[%s4237_s1 + $0xb0] sm:$0xff] }
  0x50   : > { %2254 = vperm.xlu0 %3213, %v2947_v15   ;;  %2205 = vperm.xlu1 %3214, %v2187_v18   ;;  %v2908_v18 = vld [vmem:[%s4237_s1 + $0xc0] sm:$0xff] }
  0x54   : > { %2440 = vperm.xlu0 %3213, %v2948_v19  }
  0x58   : > { %2445 = vperm.xlu0 %3213, %v2949_v27  }
  0x5c   : > { %3216 = vperm.xlu0 %3213, %v3215_v34   ;;  %v2935_v34 = vld [vmem:[%s4237_s1 + $0x118] sm:$0xff] }
  0x86   : > { %v297_v16 = vpop.permute.xlu0 %296  ;;  %v295_v17 = vpop.permute.xlu1 %294 }
  0x87   : > { %v301_v24 = vsel %vm300_vm5, %v295_v17, %v297_v16 }
  0x8a   : > { %v299_v20 = vpop.permute.xlu0 %298  ;;  %v687_v21 = vpop.permute.xlu1 %686 }
  0x8b   : > { %v302_v22 = vsel %vm300_vm5, %v297_v16, %v299_v20  ;;  %v2899_v16 = vld [vmem:[%s4237_s1 + $0xb8] sm:$0xff] }
  0x8c   : > { %319 = vmatprep.subr.mxu1 %v302_v22  ;;  %v2909_v22 = vld [vmem:[%s4237_s1 + $0xc8] sm:$0xff] }
  0x8d   : > { %320 = vmatpush1.msra.mxu1 %v301_v24  ;;  %v2911_v24 = vld [vmem:[%s4237_s1 + $0xd8] sm:$0xff] }
  0x8e   : > { %v3408_v25 = vpop.permute.xlu0 %688  ;;  %2844 = vmatmul.mubr.msk.f32.vlgmr.msra.gmra.mrb[0].mxu1 %vm306_vm6, %v2840_v23  ;;  %3011 = vmatprep.subr.mxu1 %v299_v20  ;;  %v685_v26 = vpop.permute.xlu1 %684 }
  0x8f   : > { %3012 = vmatpush3.msra.mxu1 %v299_v20  ;;  %v3415_v30 = vsel %vm690_vm10, %v687_v21, %v3408_v25  ;;  %389 = vmatprep.mubr.f32.mxu1 %v3280_v0  ;;  %v3418_v31 = vsel %vm690_vm10, %v685_v26, %v687_v21  ;;  %v2920_v26 = vld [vmem:[%s4237_s1 + $0xe0] sm:$0xff] }
  0x90   : > { %708 = vmatprep.subr.mxu0 %v3415_v30  ;;  %505 = vmatprep.subr.mxu1 %v3346_v1 }
  0x91   : > { %709 = vmatpush1.msra.mxu0 %v3418_v31 }
  0x92   : > { %v902_v35 = vpop.permute.xlu0 %901  ;;  %2845 = vmatmul.mubr.msk.f32.gmra.mrb[2].mxu1 %vm306_vm6, %v2841_v32  ;;  %2864 = vmatmul.mubr.msk.f32.vlgmr.msra.gmra.mrb[0].mxu0 %vm306_vm6, %v3426_v33  ;;  %v3434_v36 = vpop.permute.xlu1 %903 }
  0x93   : > { %v907_v37 = vsel %vm905_vm11, %v902_v35, %v3434_v36  ;;  %395 = vmatprep.mubr.f32.mxu1 %v3280_v0  ;;  %778 = vmatprep.mubr.f32.mxu0 %v3280_v0 }
  0x94   : > { %923 = vmatprep.subr.mxu0 %v907_v37 }
  0x96   : > { %v900_v40 = vpop.permute.xlu0 %899  ;;  %2846 = vmatmul.mubr.msk.f32.gmra.mrb[4].mxu1 %vm306_vm6, %v2842_v38  ;;  %2865 = vmatmul.mubr.msk.f32.gmra.mrb[2].mxu0 %vm306_vm6, %v3446_v39  ;;  %v1117_v41 = vpop.permute.xlu1 %1116 }
  0x97   : > { %v906_v42 = vsel %vm905_vm11, %v900_v40, %v902_v35  ;;  %401 = vmatprep.mubr.f32.mxu1 %v3280_v0  ;;  %784 = vmatprep.mubr.f32.mxu0 %v3280_v0 }
  0x98   : > { %924 = vmatpush1.msra.mxu0 %v906_v42 }
  0x9a   : > { %2847 = vmatmul.mubr.msk.f32.gmra.mrb[6].mxu1 %vm306_vm6, %v2843_v43  ;;  %2866 = vmatmul.mubr.msk.f32.gmra.mrb[4].mxu0 %vm306_vm6, %v3460_v44  ;;  %v3465_v45 = vpop.permute.xlu0 %1118  ;;  %v1115_v46 = vpop.permute.xlu1 %1114 }
  0x9b   : > { %3013 = vmatprep.mubr.msk.f32.mxu1 %vm306_vm6, %v2840_v23  ;;  %987 = vmatprep.mubr.f32.mxu0 %v3280_v0  ;;  %v1122_v48 = vsel %vm1120_vm12, %v1117_v41, %v3465_v45  ;;  %v1121_v49 = vsel %vm1120_vm12, %v1115_v46, %v1117_v41  ;;  %v2910_v23 = vld [vmem:[%s4237_s1 + $0xd0] sm:$0xff] }
  0x9c   : > { %1138 = vmatprep.subr.mxu0 %v1122_v48 }
  0x9e   : > { %3014 = vmatmul.mubr.msk.f32.vlgmr.msra.gmra.mrb[8].mxu1 %vm306_vm6, %v2841_v32  ;;  %2876 = vmatmul.mubr.msk.f32.vlgmr.msra.gmra.mrb[0].mxu0 %vm306_vm6, %v3472_v47  ;;  %v1332_v50 = vpop.permute.xlu0 %1331  ;;  %v3478_v51 = vpop.permute.xlu1 %1333  ;;  %v2933_v32 = vld [vmem:[%s4237_s1 + $0x108] sm:$0xff] }
  0x9f   : > { %1139 = vmatpush1.msra.mxu0 %v1121_v49  ;;  %3016 = vmatprep.mubr.msk.f32.mxu1 %vm306_vm6, %v2842_v38  ;;  %v1337_v53 = vsel %vm1335_vm13, %v1332_v50, %v3478_v51  ;;  %v2220_v49 = vld [vmem:[%s4240_s4] sm:$0x7] }
  0xa0   : > { %993 = vmatprep.mubr.f32.mxu0 %v3280_v0  ;;  %506 = vmatpush1.msra.mxu1 %v3348_v2  ;;  %v285_v2 = vld [vmem:[%s4237_s1 + $0x18] sm:$0xff] }
  0xa1   : > { %3019 = vmatprep.subr.mxu1 %v3352_v3  ;;  %1353 = vmatprep.subr.mxu0 %v1337_v53 }
  0xa2   : > { %3017 = vmatmul.mubr.msk.f32.gmra.mrb[10].mxu1 %vm306_vm6, %v2843_v43  ;;  %2877 = vmatmul.mubr.msk.f32.gmra.mrb[2].mxu0 %vm306_vm6, %v3484_v52  ;;  %v1330_v56 = vpop.permute.xlu0 %1329  ;;  %v1547_v63 = vpop.permute.xlu1 %1546 }
  0xa3   : > { %569 = vmatprep.mubr.f32.mxu1 %v3280_v0  ;;  %999 = vmatprep.mubr.f32.mxu0 %v3280_v0  ;;  %v1336_v62 = vsel %vm1335_vm13, %v1330_v56, %v1332_v50 }
  0xa6   : > { %2852 = vmatmul.mubr.msk.f32.vlgmr.msra.gmra.mrb[0].mxu1 %vm306_vm6, %v282_v54  ;;  %2878 = vmatmul.mubr.msk.f32.gmra.mrb[4].mxu0 %vm306_vm6, %v3502_v55  ;;  %v3522_v59 = vpop.permute.xlu0 %1548  ;;  %v1545_v6 = vpop.permute.xlu1 %1544 }
  0xa7   : > { %3020 = vmatpush3.msra.mxu1 %v3352_v3  ;;  %575 = vmatprep.mubr.f32.mxu1 %v3280_v0  ;;  %v1552_v1 = vsel %vm1550_vm14, %v1547_v63, %v3522_v59  ;;  %v3547_v3 = vld [vmem:[%s4237_s1 + $0x88] sm:$0xff]  ;;  %v1551_v10 = vsel %vm1550_vm14, %v1545_v6, %v1547_v63 }
  0xa8   : > { %3083 = vmatprep.subr.mxu1 %v3415_v30  ;;  %1005 = vmatprep.mubr.f32.mxu0 %v3280_v0  ;;  %v2923_v30 = vld [vmem:[%s4237_s1 + $0xf8] sm:$0xff] }
  0xaa   : > { %2853 = vmatmul.mubr.msk.f32.gmra.mrb[2].mxu1 %vm306_vm6, %v283_v57  ;;  %2879 = vmatmul.mubr.msk.f32.gmra.mrb[6].mxu0 %vm306_vm6, %v3515_v58  ;;  %v3583_v9 = vpop.permute.xlu1 %1763  ;;  %v1762_v11 = vpop.permute.xlu0 %1761 }
  0xab   : > { %581 = vmatprep.mubr.f32.mxu1 %v3280_v0  ;;  %1202 = vmatprep.mubr.f32.mxu0 %v3280_v0  ;;  %v1767_v12 = vsel %vm1765_vm15, %v1762_v11, %v3583_v9 }
  0xae   : > { %2854 = vmatmul.mubr.msk.f32.gmra.mrb[4].mxu1 %vm306_vm6, %v284_v60  ;;  %2888 = vmatmul.mubr.msk.f32.vlgmr.msra.gmra.mrb[0].mxu0 %vm306_vm6, %v3532_v61  ;;  %v1760_v15 = vpop.permute.xlu0 %1759  ;;  %v1977_v20 = vpop.permute.xlu1 %1976 }
  0xaf   : > { %1354 = vmatpush1.msra.mxu0 %v1336_v62  ;;  %587 = vmatprep.mubr.f32.mxu1 %v3280_v0  ;;  %v1766_v19 = vsel %vm1765_vm15, %v1760_v15, %v1762_v11 }
  0xb0   : > { %1208 = vmatprep.mubr.f32.mxu0 %v3280_v0  ;;  %1568 = vmatprep.subr.mxu0 %v1552_v1 }
  0xb2   : > { %2855 = vmatmul.mubr.msk.f32.gmra.mrb[6].mxu1 %vm306_vm6, %v285_v2  ;;  %2889 = vmatmul.mubr.msk.f32.gmra.mrb[2].mxu0 %vm306_vm6, %v3547_v3  ;;  %v1979_v17 = vpop.permute.xlu0 %1978 }
  0xb3   : > { %3021 = vmatprep.mubr.msk.f32.mxu1 %vm306_vm6, %v282_v54  ;;  %1214 = vmatprep.mubr.f32.mxu0 %v3280_v0  ;;  %v1982_v21 = vsel %vm1980_vm0, %v1977_v20, %v1979_v17 }
  0xb6   : > { %3022 = vmatmul.mubr.msk.f32.vlgmr.msra.gmra.mrb[8].mxu1 %vm306_vm6, %v283_v57  ;;  %2890 = vmatmul.mubr.msk.f32.gmra.mrb[4].mxu0 %vm306_vm6, %v3558_v4 }
  0xb7   : > { %3084 = vmatpush1.msra.mxu1 %v3418_v31  ;;  %3024 = vmatprep.mubr.msk.f32.mxu1 %vm306_vm6, %v284_v60  ;;  %v2932_v31 = vld [vmem:[%s4237_s1 + $0x100] sm:$0xff] }
  0xb8   : > { %3027 = vmatprep.subr.mxu1 %v3408_v25  ;;  %1220 = vmatprep.mubr.f32.mxu0 %v3280_v0 }
  0xba   : > { %3025 = vmatmul.mubr.msk.f32.gmra.mrb[10].mxu1 %vm306_vm6, %v285_v2  ;;  %2891 = vmatmul.mubr.msk.f32.gmra.mrb[6].mxu0 %vm306_vm6, %v3568_v5 }
  0xbb   : > { %790 = vmatprep.mubr.f32.mxu1 %v3280_v0  ;;  %1417 = vmatprep.mubr.f32.mxu0 %v3280_v0 }
  0xbe   : > { %2867 = vmatmul.mubr.msk.f32.vlgmr.msra.gmra.mrb[6].mxu1 %vm306_vm6, %v2863_v7  ;;  %2900 = vmatmul.mubr.msk.f32.vlgmr.msra.gmra.mrb[0].mxu0 %vm306_vm6, %v2896_v8 }
  0xbf   : > { %3028 = vmatpush3.msra.mxu1 %v3408_v25  ;;  %1569 = vmatpush1.msra.mxu0 %v1551_v10  ;;  %v1975_v25 = vpop.permute.xlu1 %1974 }
  0xc0   : > { %3035 = vmatprep.subr.mxu1 %v3434_v36  ;;  %3029 = vmatprep.mubr.msk.f32.mxu1 %vm306_vm6, %v3426_v33  ;;  %v1981_v27 = vsel %vm1980_vm0, %v1975_v25, %v1977_v20  ;;  %v2934_v33 = vld [vmem:[%s4237_s1 + $0x110] sm:$0xff] }
  0xc1   : > { %1423 = vmatprep.mubr.f32.mxu0 %v3280_v0  ;;  %1783 = vmatprep.subr.mxu0 %v1767_v12 }
  0xc2   : > { %3030 = vmatmul.mubr.msk.f32.vlgmr.msra.gmra.mrb[8].mxu1 %vm306_vm6, %v3446_v39  ;;  %2901 = vmatmul.mubr.msk.f32.gmra.mrb[2].mxu0 %vm306_vm6, %v2897_v13 }
  0xc3   : > { %3036 = vmatpush3.msra.mxu1 %v3434_v36  ;;  %3032 = vmatprep.mubr.msk.f32.mxu1 %vm306_vm6, %v3460_v44  ;;  %v2191_v43 = vpop.permute.xlu0 %2190 }
  0xc4   : > { %3043 = vmatprep.subr.mxu1 %v3465_v45  ;;  %1429 = vmatprep.mubr.f32.mxu0 %v3280_v0 }
  0xc6   : > { %3033 = vmatmul.mubr.msk.f32.gmra.mrb[10].mxu1 %vm306_vm6, %v2863_v7  ;;  %2902 = vmatmul.mubr.msk.f32.gmra.mrb[4].mxu0 %vm306_vm6, %v2898_v14 }
  0xc7   : > { %3037 = vmatprep.mubr.msk.f32.mxu1 %vm306_vm6, %v3472_v47  ;;  %1435 = vmatprep.mubr.f32.mxu0 %v3280_v0  ;;  %v3726_v44 = vpop.permute.xlu0 %2244 }
  0xca   : > { %3038 = vmatmul.mubr.msk.f32.vlgmr.msra.gmra.mrb[8].mxu1 %vm306_vm6, %v3484_v52  ;;  %2903 = vmatmul.mubr.msk.f32.gmra.mrb[6].mxu0 %vm306_vm6, %v2899_v16 }
  0xcb   : > { %3044 = vmatpush3.msra.mxu1 %v3465_v45  ;;  %3040 = vmatprep.mubr.msk.f32.mxu1 %vm306_vm6, %v3502_v55  ;;  %v2258_v45 = vlaneseq  ;;  %v3728_v46 = vpop.permute.xlu0 %2249  ;;  %v3741_v55 = vpop.permute.xlu1 %2239 }
  0xcc   : > { %3051 = vmatprep.subr.mxu1 %v3478_v51  ;;  %1632 = vmatprep.mubr.f32.mxu0 %v3280_v0 }
  0xce   : > { %3041 = vmatmul.mubr.msk.f32.gmra.mrb[10].mxu1 %vm306_vm6, %v3515_v58  ;;  %2912 = vmatmul.mubr.msk.f32.vlgmr.msra.gmra.mrb[0].mxu0 %vm306_vm6, %v2908_v18 }
  0xcf   : > { %1784 = vmatpush1.msra.mxu0 %v1766_v19  ;;  %3045 = vmatprep.mubr.msk.f32.mxu1 %vm306_vm6, %v3532_v61  ;;  %v3730_v47 = vpop.permute.xlu0 %2254 }
  0xd0   : > { %1638 = vmatprep.mubr.f32.mxu0 %v3280_v0  ;;  %1998 = vmatprep.subr.mxu0 %v1982_v21  ;;  %4248 = vst [vmem:[#allocation2_spill] sm:$0xff] %v3730_v47 }
  0xd2   : > { %3046 = vmatmul.mubr.msk.f32.vlgmr.msra.gmra.mrb[8].mxu1 %vm306_vm6, %v3547_v3  ;;  %2913 = vmatmul.mubr.msk.f32.gmra.mrb[2].mxu0 %vm306_vm6, %v2909_v22 }
  0xd3   : > { %3052 = vmatpush3.msra.mxu1 %v3478_v51  ;;  %3048 = vmatprep.mubr.msk.f32.mxu1 %vm306_vm6, %v3558_v4  ;;  %v3737_v53 = vpop.permute.xlu0 %2440 }
  0xd4   : > { %3059 = vmatprep.subr.mxu1 %v3522_v59  ;;  %1644 = vmatprep.mubr.f32.mxu0 %v3280_v0 }
  0xd6   : > { %3049 = vmatmul.mubr.msk.f32.gmra.mrb[10].mxu1 %vm306_vm6, %v3568_v5  ;;  %2914 = vmatmul.mubr.msk.f32.gmra.mrb[4].mxu0 %vm306_vm6, %v2910_v23 }
  0xd7   : > { %3053 = vmatprep.mubr.msk.f32.mxu1 %vm306_vm6, %v2896_v8  ;;  %1650 = vmatprep.mubr.f32.mxu0 %v3280_v0  ;;  %v3763_v3 = vpop.permute.xlu0 %2445 }
  0xda   : > { %3054 = vmatmul.mubr.msk.f32.vlgmr.msra.gmra.mrb[8].mxu1 %vm306_vm6, %v2897_v13  ;;  %2915 = vmatmul.mubr.msk.f32.gmra.mrb[6].mxu0 %vm306_vm6, %v2911_v24 }
  0xdb   : > { %3060 = vmatpush3.msra.mxu1 %v3522_v59  ;;  %3056 = vmatprep.mubr.msk.f32.mxu1 %vm306_vm6, %v2898_v14  ;;  %v2196_v14 = vpop.permute.xlu1 %2195 }
  0xdc   : > { %3067 = vmatprep.subr.mxu1 %v3583_v9  ;;  %1847 = vmatprep.mubr.f32.mxu0 %v3280_v0 }
  0xde   : > { %3057 = vmatmul.mubr.msk.f32.gmra.mrb[10].mxu1 %vm306_vm6, %v2899_v16  ;;  %2924 = vmatmul.mubr.msk.f32.vlgmr.msra.gmra.mrb[0].mxu0 %vm306_vm6, %v2920_v26 }
  0xdf   : > { %1999 = vmatpush1.msra.mxu0 %v1981_v27  ;;  %3061 = vmatprep.mubr.msk.f32.mxu1 %vm306_vm6, %v2908_v18 }
  0xe0   : > { %1853 = vmatprep.mubr.f32.mxu0 %v3280_v0 }
  0xe2   : > { %3062 = vmatmul.mubr.msk.f32.vlgmr.msra.gmra.mrb[8].mxu1 %vm306_vm6, %v2909_v22  ;;  %2925 = vmatmul.mubr.msk.f32.gmra.mrb[2].mxu0 %vm306_vm6, %v2921_v28 }
  0xe3   : > { %3068 = vmatpush3.msra.mxu1 %v3583_v9  ;;  %3064 = vmatprep.mubr.msk.f32.mxu1 %vm306_vm6, %v2910_v23 }
  0xe4   : > { %3075 = vmatprep.subr.mxu1 %v1979_v17  ;;  %1859 = vmatprep.mubr.f32.mxu0 %v3280_v0 }
  0xe6   : > { %3065 = vmatmul.mubr.msk.f32.gmra.mrb[10].mxu1 %vm306_vm6, %v2911_v24  ;;  %2926 = vmatmul.mubr.msk.f32.gmra.mrb[4].mxu0 %vm306_vm6, %v2922_v29 }
  0xe7   : > { %1865 = vmatprep.mubr.f32.mxu0 %v3280_v0  ;;  %3069 = vmatprep.mubr.msk.f32.mxu1 %vm306_vm6, %v2920_v26 }
  0xea   : > { %2927 = vmatmul.mubr.msk.f32.gmra.mrb[6].mxu0 %vm306_vm6, %v2923_v30  ;;  %3070 = vmatmul.mubr.msk.f32.vlgmr.msra.gmra.mrb[8].mxu1 %vm306_vm6, %v2921_v28 }
  0xeb   : > { %3076 = vmatpush3.msra.mxu1 %v1979_v17  ;;  %3072 = vmatprep.mubr.msk.f32.mxu1 %vm306_vm6, %v2922_v29 }
  0xec   : > { %2062 = vmatprep.mubr.f32.mxu0 %v3280_v0 }
  0xee   : > { %3073 = vmatmul.mubr.msk.f32.gmra.mrb[10].mxu1 %vm306_vm6, %v2923_v30  ;;  %2936 = vmatmul.mubr.msk.f32.vlgmr.msra.gmra.mrb[0].mxu0 %vm306_vm6, %v2932_v31 }
  0xef   : > { %2068 = vmatprep.mubr.f32.mxu0 %v3280_v0  ;;  %3077 = vmatprep.mubr.msk.f32.mxu1 %vm306_vm6, %v2932_v31 }
  0xf2   : > { %2937 = vmatmul.mubr.msk.f32.gmra.mrb[2].mxu0 %vm306_vm6, %v2933_v32  ;;  %3078 = vmatmul.mubr.msk.f32.vlgmr.msra.gmra.mrb[8].mxu1 %vm306_vm6, %v2933_v32 }
  0xf3   : > { %2074 = vmatprep.mubr.f32.mxu0 %v3280_v0  ;;  %3080 = vmatprep.mubr.msk.f32.mxu1 %vm306_vm6, %v2934_v33 }
  0xf6   : > { %2938 = vmatmul.mubr.msk.f32.gmra.mrb[4].mxu0 %vm306_vm6, %v2934_v33  ;;  %3081 = vmatmul.mubr.msk.f32.gmra.mrb[10].mxu1 %vm306_vm6, %v2935_v34 }
  0xf7   : > { %2080 = vmatprep.mubr.f32.mxu0 %v3280_v0  ;;  %v2259_v0 = vshrl.u32 %v2258_v45, 7 }
  0xf9   : > { %v2260_v48 = vsub.s32 0, %v2259_v0  ;;  %v2264_v50 = vsub.s32 1, %v2259_v0  ;;  %v2268_v51 = vsub.s32 2, %v2259_v0 }
  0xfa   : > { %2939 = vmatmul.mubr.msk.f32.gmra.mrb[6].mxu0 %vm306_vm6, %v2935_v34 }
  0xfb   : > { %v3735_v52 = vrot.slane %v2220_v49, %v2260_v48  ;;  %v3739_v54 = vrot.slane %v2220_v49, %v2264_v50  ;;  %v3743_v57 = vrot.slane %v2220_v49, %v2268_v51 }
  0xfd   : > { %v3747_v58 = vmul.f32 %v3735_v52, %v3741_v55  ;;  %v3751_v59 = vmul.f32 %v3737_v53, %v3735_v52  ;;  %v3755_v62 = vmul.f32 %v3739_v54, %v3741_v55  ;;  %v3759_v63 = vmul.f32 %v3737_v53, %v3739_v54 }
  0xfe   : > { %v3769_v7 = vmul.f32 %v3743_v57, %v3741_v55  ;;  %v3777_v13 = vmul.f32 %v3737_v53, %v3743_v57  ;;  %v3789_v20 = vmul.f32 %v3735_v52, %v3726_v44  ;;  %v3795_v26 = vmul.f32 %v3763_v3, %v3735_v52 }
  0xff   : > { %v3799_v27 = vmul.f32 %v3743_v57, %v3726_v44  ;;  %v3803_v28 = vmul.f32 %v3763_v3, %v3743_v57  ;;  %v3818_v45 = vmul.f32 %v3739_v54, %v3726_v44  ;;  %v3822_v0 = vmul.f32 %v3735_v52, %v3728_v46 }
 0x100   : > { %v3826_v48 = vmul.f32 %v3763_v3, %v3739_v54 }
 0x179   : > { %v571_v35 = vpop.f32.mrb[0].mxu1 }
 0x17a   : > { %v573_v36 = vpop.f32.mrb[1].mxu1 }
 0x17d   : > { %v577_v37 = vpop.f32.mrb[2].mxu1 }
 0x17e   : > { %v579_v38 = vpop.f32.mrb[3].mxu1 }
 0x181   : > { %v3718_v39 = vpop.f32.mrb[4].mxu1 }
 0x182   : > { %v3720_v40 = vpop.f32.mrb[5].mxu1 }
 0x191   : > { %v3722_v41 = vpop.f32.mrb[6].mxu1 }
 0x192   : > { %v3724_v42 = vpop.f32.mrb[7].mxu1 }
 0x1c1   : > { %v2064_v56 = vpop.f32.mrb[0].mxu0 }
 0x1c2   : > { %v3085_v60 = vadd.f32 %v2064_v56, %v571_v35  ;;  %v2066_v61 = vpop.f32.mrb[1].mxu0  ;;  %v3217_v35 = vpop.permute.xlu0 %3216 }
 0x1c3   : > { %v3086_v1 = vadd.f32 %v2066_v61, %v573_v36  ;;  %v3831_v56 = vunpack.i.l.bf16 %v3217_v35 }
 0x1c4   : > { %v3761_v2 = vadd.f32 %v3085_v60, %v2191_v43 }
 0x1c5   : > { %v3765_v4 = vadd.f32 %v3086_v1, %v2191_v43  ;;  %v2070_v5 = vpop.f32.mrb[2].mxu0  ;;  %v3079_v6 = vpop.f32.mrb[8].mxu1 }
 0x1c6   : > { %v2285_v8 = vmul.f32 %v3747_v58, %v3761_v2  ;;  %v2470_v9 = vmul.f32 %v3751_v59, %v3761_v2  ;;  %v3087_v10 = vadd.f32 %v2070_v5, %v577_v37  ;;  %v2072_v11 = vpop.f32.mrb[3].mxu0  ;;  %v2153_v12 = vpop.f32.mrb[9].mxu1  ;;  %v3805_v31 = vadd.f32 %v3079_v6, %v2196_v14 }
 0x1c7   : > { %v2286_v15 = vmul.f32 %v3755_v62, %v3765_v4  ;;  %v2471_v16 = vmul.f32 %v3759_v63, %v3765_v4  ;;  %v3088_v17 = vadd.f32 %v2072_v11, %v579_v38  ;;  %v3783_v18 = vadd.f32 %v2191_v43, %v2153_v12  ;;  %v2201_v5 = vpop.permute.xlu1 %2200 }
 0x1c8   : > { %v3785_v19 = vadd.f32 %v3087_v10, %v2196_v14  ;;  %v2290_v61 = vmul.f32 %v3799_v27, %v3805_v31  ;;  %v2475_v1 = vmul.f32 %v3803_v28, %v3805_v31 }
 0x1c9   : > { %v2297_v21 = vadd.f32 %v2286_v15, %v2285_v8  ;;  %v2287_v22 = vmul.f32 %v3769_v7, %v3783_v18  ;;  %v2076_v23 = vpop.f32.mrb[4].mxu0  ;;  %v3082_v24 = vpop.f32.mrb[10].mxu1  ;;  %v2482_v25 = vadd.f32 %v2471_v16, %v2470_v9  ;;  %v3807_v32 = vadd.f32 %v3088_v17, %v2196_v14 }
 0x1ca   : > { %v2078_v29 = vpop.f32.mrb[5].mxu0  ;;  %v2163_v30 = vpop.f32.mrb[11].mxu1  ;;  %v2472_v34 = vmul.f32 %v3777_v13, %v3783_v18  ;;  %v2288_v36 = vmul.f32 %v3789_v20, %v3785_v19  ;;  %v3089_v38 = vadd.f32 %v2076_v23, %v3718_v39  ;;  %v2473_v39 = vmul.f32 %v3795_v26, %v3785_v19 }
 0x1cb   : > { %v2299_v33 = vsel %vm2298_vm1, %v2287_v22, 0.0  ;;  %v3090_v43 = vadd.f32 %v2078_v29, %v3720_v40  ;;  %v2289_v9 = vmul.f32 %v3818_v45, %v3807_v32  ;;  %v2474_v10 = vmul.f32 %v3826_v48, %v3807_v32 }
 0x1cc   : > { %v2300_v37 = vadd.f32 %v2299_v33, %v2297_v21  ;;  %v2483_v49 = vsel %vm2298_vm1, %v2472_v34, 0.0  ;;  %v3843_v12 = vadd.f32 %v3089_v38, %v2201_v5  ;;  %v3847_v14 = vmul.f32 %v3739_v54, %v3728_v46 }
 0x1cd   : > { %v2082_v50 = vpop.f32.mrb[6].mxu0  ;;  %v2484_v40 = vadd.f32 %v2483_v49, %v2482_v25  ;;  %v3849_v15 = vunpack.i.h.bf16 %v3217_v35  ;;  %v3851_v16 = vadd.f32 %v3090_v43, %v2201_v5  ;;  %v3861_v17 = vmul.f32 %v3743_v57, %v3728_v46 }
 0x1ce   : > { %v2301_v51 = vadd.f32 %v2300_v37, %v2288_v36  ;;  %v2084_v60 = vpop.f32.mrb[7].mxu0  ;;  %v3091_v6 = vadd.f32 %v2082_v50, %v3722_v41  ;;  %v3853_v41 = vadd.f32 %v2201_v5, %v2163_v30  ;;  %v2303_v23 = vsel %vm2298_vm1, %v2290_v61, 0.0  ;;  %v2206_v37 = vpop.permute.xlu1 %2205 }
 0x1cf   : > { %v3092_v8 = vadd.f32 %v2084_v60, %v3724_v42  ;;  %v2485_v11 = vadd.f32 %v2484_v40, %v2473_v39  ;;  %4249 = vst [vmem:[#allocation3_spill] sm:$0xff] %v3849_v15  ;;  %v3857_v42 = vmul.f32 %v3831_v56, %v3735_v52  ;;  %v2487_v25 = vsel %vm2298_vm1, %v2475_v1, 0.0 }
 0x1d0   : > { %v2302_v21 = vadd.f32 %v2301_v51, %v2289_v9  ;;  %v3867_v29 = vmul.f32 %v3831_v56, %v3739_v54  ;;  %v3871_v30 = vmul.f32 %v3831_v56, %v3743_v57  ;;  %v2291_v33 = vmul.f32 %v3822_v0, %v3843_v12 }
 0x1d1   : > { %v2486_v22 = vadd.f32 %v2485_v11, %v2474_v10  ;;  %v2476_v34 = vmul.f32 %v3857_v42, %v3843_v12  ;;  %v2292_v38 = vmul.f32 %v3847_v14, %v3851_v16  ;;  %v2293_v43 = vmul.f32 %v3861_v17, %v3853_v41 }
 0x1d2   : > { %v2304_v35 = vadd.f32 %v2303_v23, %v2302_v21  ;;  %v2478_v49 = vmul.f32 %v3871_v30, %v3853_v41  ;;  %v2477_v50 = vmul.f32 %v3867_v29, %v3851_v16  ;;  %v3885_v39 = vadd.f32 %v3091_v6, %v2206_v37 }
 0x1d3   : > { %v2488_v36 = vadd.f32 %v2487_v25, %v2486_v22  ;;  %v3887_v60 = vadd.f32 %v3082_v24, %v2206_v37  ;;  %v3891_v61 = vmul.f32 %v3735_v52, %v3730_v47  ;;  %v3893_v1 = vadd.f32 %v3092_v8, %v2206_v37 }
 0x1d4   : > { %v2305_v51 = vadd.f32 %v2304_v35, %v2291_v33  ;;  %v3897_v9 = vmul.f32 %v3849_v15, %v3735_v52  ;;  %v3901_v6 = vmul.f32 %v3739_v54, %v3730_v47  ;;  %v3905_v24 = vmul.f32 %v3743_v57, %v3730_v47 }
 0x1d5   : > { %v2489_v40 = vadd.f32 %v2488_v36, %v2476_v34  ;;  %v2307_v11 = vsel %vm2298_vm1, %v2293_v43, 0.0  ;;  %v2491_v21 = vsel %vm2298_vm1, %v2478_v49, 0.0  ;;  %v2294_v8 = vmul.f32 %v3891_v61, %v3885_v39 }
 0x1d6   : > { %v2306_v5 = vadd.f32 %v2305_v51, %v2292_v38  ;;  %v2479_v52 = vmul.f32 %v3897_v9, %v3885_v39  ;;  %v2296_v25 = vmul.f32 %v3905_v24, %v3887_v60  ;;  %v2295_v33 = vmul.f32 %v3901_v6, %v3893_v1 }
 0x1d7   : > { %v2490_v10 = vadd.f32 %v2489_v40, %v2477_v50  ;;  %v3919_v35 = vmul.f32 %v3849_v15, %v3739_v54  ;;  %v3923_v37 = vmul.f32 %v3849_v15, %v3743_v57 }
 0x1d8   : > { %v2308_v22 = vadd.f32 %v2307_v11, %v2306_v5  ;;  %v2311_v49 = vsel %vm2298_vm1, %v2296_v25, 0.0 }
 0x1d9   : > { %v2492_v23 = vadd.f32 %v2491_v21, %v2490_v10  ;;  %v2480_v43 = vmul.f32 %v3919_v35, %v3893_v1  ;;  %v2481_v50 = vmul.f32 %v3923_v37, %v3887_v60 }
 0x1da   : > { %v2309_v34 = vadd.f32 %v2308_v22, %v2294_v8 }
 0x1db   : > { %v2493_v36 = vadd.f32 %v2492_v23, %v2479_v52  ;;  %v2495_v54 = vsel %vm2298_vm1, %v2481_v50, 0.0 }
 0x1dc   : > { %v2310_v38 = vadd.f32 %v2309_v34, %v2295_v33 }
 0x1dd   : > { %v2494_v40 = vadd.f32 %v2493_v36, %v2480_v43 }
 0x1de   : > { %v2312_v51 = vadd.f32 %v2311_v49, %v2310_v38 }
 0x1df   : > { %v2496_v5 = vadd.f32 %v2495_v54, %v2494_v40 }
 0x1e0   : > { %2313 = vadd.xlane.f32.xlu1 %v2312_v51 }
 0x1e4   : > { %2497 = vadd.xlane.f32.xlu1 %v2496_v5 }
 0x26d   : > { %v2314_v10 = vpop.xlane.xlu1 %2313 }
 0x26e   : > { %v2315_v11 = vrot.slane %v2314_v10, 4 }
 0x270   : > { %v2316_v57 = vadd.f32 %v2315_v11, %v2314_v10 }
 0x272   : > { %v2317_v21 = vrot.slane %v2316_v57, 2 }
 0x274   : > { %v2318_v8 = vadd.f32 %v2317_v21, %v2316_v57 }
 0x276   : > { %v2319_v22 = vrot.slane %v2318_v8, 1 }
 0x278   : > { %v2320_v52 = vadd.f32 %v2319_v22, %v2318_v8 }
 0x27a   : > { %3183 = vpush %v2320_v52 }
 0x2ab   : > { %s3184_s21 = spop %3183 }
 0x2ac   : > { %s2322_s22 = smul.f32 0.00024414063, %s3184_s21 }
 0x2ae   : > { %v2323_v23 = vstv %s2322_s22 }
 0x2af   : > { %v3932_v25 = vsub.f32 %v3761_v2, %v2323_v23  ;;  %v3935_v33 = vsub.f32 %v3765_v4, %v2323_v23  ;;  %v3938_v34 = vsub.f32 %v3783_v18, %v2323_v23  ;;  %v3941_v36 = vsub.f32 %v3785_v19, %v2323_v23 }
 0x2b0   : > { %v3950_v50 = vsub.f32 %v3805_v31, %v2323_v23  ;;  %v3953_v51 = vsub.f32 %v3807_v32, %v2323_v23  ;;  %v3963_v57 = vsub.f32 %v3843_v12, %v2323_v23 }
 0x2b1   : > { %v2336_v38 = vmul.f32 %v3932_v25, %v3932_v25  ;;  %v2337_v43 = vmul.f32 %v3935_v33, %v3935_v33  ;;  %v2338_v49 = vmul.f32 %v3938_v34, %v3938_v34  ;;  %v2339_v10 = vmul.f32 %v3941_v36, %v3941_v36 }
 0x2b2   : > { %v2341_v11 = vmul.f32 %v3950_v50, %v3950_v50  ;;  %v2340_v21 = vmul.f32 %v3953_v51, %v3953_v51 }
 0x2b3   : > { %v2348_v40 = vmul.f32 %v2336_v38, %v3747_v58  ;;  %v2349_v54 = vmul.f32 %v2337_v43, %v3755_v62  ;;  %v2350_v5 = vmul.f32 %v2338_v49, %v3769_v7  ;;  %v3969_v58 = vsub.f32 %v3853_v41, %v2323_v23 }
 0x2b4   : > { %v3972_v62 = vsub.f32 %v3851_v16, %v2323_v23  ;;  %v2351_v7 = vmul.f32 %v2339_v10, %v3789_v20  ;;  %v2353_v38 = vmul.f32 %v2341_v11, %v3799_v27  ;;  %v2342_v43 = vmul.f32 %v3963_v57, %v3963_v57 }
 0x2b5   : > { %v2360_v8 = vadd.f32 %v2349_v54, %v2348_v40  ;;  %v2361_v22 = vsel %vm2298_vm1, %v2350_v5, 0.0  ;;  %v2352_v49 = vmul.f32 %v2340_v21, %v3818_v45  ;;  %v2344_v40 = vmul.f32 %v3969_v58, %v3969_v58 }
 0x2b6   : > { %v3982_v54 = vsub.f32 %v3885_v39, %v2323_v23  ;;  %v2343_v5 = vmul.f32 %v3972_v62, %v3972_v62  ;;  %v3987_v20 = vsub.f32 %v3887_v60, %v2323_v23  ;;  %v2365_v27 = vsel %vm2298_vm1, %v2353_v38, 0.0 }
 0x2b7   : > { %v2362_v52 = vadd.f32 %v2361_v22, %v2360_v8  ;;  %v3991_v10 = vsub.f32 %v3893_v1, %v2323_v23  ;;  %v2354_v45 = vmul.f32 %v2342_v43, %v3822_v0  ;;  %v2356_v21 = vmul.f32 %v2344_v40, %v3861_v17 }
 0x2b8   : > { %v2345_v8 = vmul.f32 %v3982_v54, %v3982_v54  ;;  %v2355_v22 = vmul.f32 %v2343_v5, %v3847_v14 }
 0x2b9   : > { %v2363_v47 = vadd.f32 %v2362_v52, %v2351_v7  ;;  %v2346_v52 = vmul.f32 %v3991_v10, %v3991_v10  ;;  %v2369_v23 = vsel %vm2298_vm1, %v2356_v21, 0.0 }
 0x2ba   : > { %v2357_v0 = vmul.f32 %v2345_v8, %v3891_v61  ;;  %v2646_v61 = vld [vmem:[%s4242_s6] sm:$0xff] }
 0x2bb   : > { %v2364_v15 = vadd.f32 %v2363_v47, %v2352_v49  ;;  %v2347_v47 = vmul.f32 %v3987_v20, %v3987_v20  ;;  %v2358_v43 = vmul.f32 %v2346_v52, %v3901_v6  ;;  %v2648_v6 = vld [vmem:[%s4242_s6 + $0x10] sm:$0xff] }
 0x2bd   : > { %v2366_v11 = vadd.f32 %v2365_v27, %v2364_v15  ;;  %v2359_v17 = vmul.f32 %v2347_v47, %v3905_v24  ;;  %v2611_v27 = vld [vmem:[%s4241_s5 + $0x8] sm:$0xff]  ;;  %v2498_v47 = vpop.xlane.xlu1 %2497 }
 0x2be   : > { %v2499_v52 = vrot.slane %v2498_v47, 4 }
 0x2bf   : > { %v2367_v7 = vadd.f32 %v2366_v11, %v2354_v45  ;;  %v2373_v14 = vsel %vm2298_vm1, %v2359_v17, 0.0 }
 0x2c1   : > { %v2368_v38 = vadd.f32 %v2367_v7, %v2355_v22 }
 0x2c3   : > { %v2370_v15 = vadd.f32 %v2369_v23, %v2368_v38  ;;  %v2500_v38 = vadd.f32 %v2499_v52, %v2498_v47 }
 0x2c5   : > { %v2371_v49 = vadd.f32 %v2370_v15, %v2357_v0  ;;  %v2501_v23 = vrot.slane %v2500_v38, 2 }
 0x2c7   : > { %v2372_v40 = vadd.f32 %v2371_v49, %v2358_v43  ;;  %v2502_v15 = vadd.f32 %v2501_v23, %v2500_v38 }
 0x2c9   : > { %v2374_v5 = vadd.f32 %v2373_v14, %v2372_v40  ;;  %v2503_v17 = vrot.slane %v2502_v15, 1 }
 0x2cb   : > { %2375 = vadd.xlane.f32.xlu0 %v2374_v5  ;;  %v2504_v49 = vadd.f32 %v2503_v17, %v2502_v15 }
 0x2e1   : > { %2621 = vperm.xlu0 %3213, %v2611_v27  }
 0x2e5   : > { %2652 = vperm.xlu0 %3213, %v2646_v61  }
 0x2e9   : > { %2662 = vperm.xlu0 %3213, %v2648_v6  }
 0x358   : > { %v2376_v24 = vpop.xlane.xlu0 %2375 }
 0x359   : > { %v2377_v45 = vrot.slane %v2376_v24, 4 }
 0x35b   : > { %v2378_v11 = vadd.f32 %v2377_v45, %v2376_v24 }
 0x35d   : > { %v2379_v21 = vrot.slane %v2378_v11, 2 }
 0x35f   : > { %v2380_v8 = vadd.f32 %v2379_v21, %v2378_v11 }
 0x361   : > { %v2381_v22 = vrot.slane %v2380_v8, 1 }
 0x363   : > { %v2382_v7 = vadd.f32 %v2381_v22, %v2380_v8 }
 0x365   : > { %3185 = vpush %v2382_v7 }
 0x396   : > { %s3186_s8 = spop %3185 }
 0x397   : > { %s2384_s9 = smul.f32 0.00024414063, %s3186_s8 }
 0x399   : > { %s2385_s10 = sadd.f32 1e-05, %s2384_s9 }
 0x39b   : > { %v2386_v0 = vstv %s2385_s10  ;;  %s4203_s10 = scalar_lea.vmem %s4243_s7, %s3182_s30 }
 0x39c   : > { %3220 = vrsqrt.f32 %v2386_v0 }
 0x3a6   : > { %v3221_v43 = vpop.eup %3220 }
 0x3a7   : > { %3187 = vpush %v3221_v43 }
 0x3a8   : > { %3189 = vpush %v2504_v49 }
 0x3d8   : > { %s4016_s11 = spop %3187 }
 0x3d9   : > { %s3190_s12 = spop %3189 }
 0x3da   : > { %s2506_s13 = smul.f32 0.00024414063, %s3190_s12 }
 0x3dc   : > { %v2507_v40 = vstv %s2506_s13 }
 0x3dd   : > { %v4019_v14 = vsub.f32 %v3761_v2, %v2507_v40  ;;  %v4022_v5 = vsub.f32 %v3765_v4, %v2507_v40  ;;  %v4025_v27 = vsub.f32 %v3783_v18, %v2507_v40  ;;  %v4028_v61 = vsub.f32 %v3785_v19, %v2507_v40 }
 0x3de   : > { %v4037_v2 = vsub.f32 %v3805_v31, %v2507_v40  ;;  %v4040_v4 = vsub.f32 %v3807_v32, %v2507_v40  ;;  %v4050_v22 = vsub.f32 %v3843_v12, %v2507_v40  ;;  %v4078_v17 = vsub.f32 %v3893_v1, %v2507_v40 }
 0x3df   : > { %v2520_v6 = vmul.f32 %v4019_v14, %v4019_v14  ;;  %v2521_v24 = vmul.f32 %v4022_v5, %v4022_v5  ;;  %v2522_v45 = vmul.f32 %v4025_v27, %v4025_v27  ;;  %v2523_v21 = vmul.f32 %v4028_v61, %v4028_v61 }
 0x3e0   : > { %v2525_v8 = vmul.f32 %v4037_v2, %v4037_v2  ;;  %v2524_v31 = vmul.f32 %v4040_v4, %v4040_v4  ;;  %v2526_v12 = vmul.f32 %v4050_v22, %v4050_v22 }
 0x3e1   : > { %v2532_v18 = vmul.f32 %v2520_v6, %v3751_v59  ;;  %v2533_v19 = vmul.f32 %v2521_v24, %v3759_v63  ;;  %v2534_v11 = vmul.f32 %v2522_v45, %v3777_v13  ;;  %v4056_v59 = vsub.f32 %v3853_v41, %v2507_v40 }
 0x3e2   : > { %v4059_v63 = vsub.f32 %v3851_v16, %v2507_v40  ;;  %v2535_v13 = vmul.f32 %v2523_v21, %v3795_v26  ;;  %v2537_v52 = vmul.f32 %v2525_v8, %v3803_v28  ;;  %v2536_v38 = vmul.f32 %v2524_v31, %v3826_v48  ;;  %v2610_v31 = vld [vmem:[%s4241_s5] sm:$0xff] }
 0x3e3   : > { %v2544_v32 = vadd.f32 %v2533_v19, %v2532_v18  ;;  %v2545_v7 = vsel %vm2298_vm1, %v2534_v11, 0.0  ;;  %v2528_v0 = vmul.f32 %v4056_v59, %v4056_v59  ;;  %v4069_v41 = vsub.f32 %v3885_v39, %v2507_v40 }
 0x3e4   : > { %v2527_v16 = vmul.f32 %v4059_v63, %v4059_v63  ;;  %v4074_v26 = vsub.f32 %v3887_v60, %v2507_v40  ;;  %v2549_v28 = vsel %vm2298_vm1, %v2537_v52, 0.0  ;;  %v2538_v48 = vmul.f32 %v2526_v12, %v3857_v42 }
 0x3e5   : > { %v2546_v47 = vadd.f32 %v2545_v7, %v2544_v32  ;;  %v2540_v49 = vmul.f32 %v2528_v0, %v3871_v30  ;;  %v2529_v39 = vmul.f32 %v4069_v41, %v4069_v41  ;;  %v2530_v45 = vmul.f32 %v4078_v17, %v4078_v17  ;;  %v2649_v32 = vld [vmem:[%s4242_s6 + $0x18] sm:$0xff] }
 0x3e6   : > { %v2539_v6 = vmul.f32 %v2527_v16, %v3867_v29  ;;  %v2531_v60 = vmul.f32 %v4074_v26, %v4074_v26 }
 0x3e7   : > { %v2547_v23 = vadd.f32 %v2546_v47, %v2535_v13  ;;  %v2553_v1 = vsel %vm2298_vm1, %v2540_v49, 0.0  ;;  %v2541_v42 = vmul.f32 %v2529_v39, %v3897_v9  ;;  %v2542_v19 = vmul.f32 %v2530_v45, %v3919_v35  ;;  %v2612_v9 = vld [vmem:[%s4241_s5 + $0x10] sm:$0xff]  ;;  %v2613_v35 = vld [vmem:[%s4241_s5 + $0x18] sm:$0xff] }
 0x3e8   : > { %v2543_v30 = vmul.f32 %v2531_v60, %v3923_v37  ;;  %v2647_v37 = vld [vmem:[%s4242_s6 + $0x8] sm:$0xff] }
 0x3e9   : > { %v2548_v15 = vadd.f32 %v2547_v23, %v2536_v38 }
 0x3ea   : > { %v2557_v29 = vsel %vm2298_vm1, %v2543_v30, 0.0 }
 0x3eb   : > { %v2550_v43 = vadd.f32 %v2549_v28, %v2548_v15  ;;  %v2389_v15 = vstv %s4016_s11 }
 0x3ec   : > { %v2390_v28 = vmul.f32 %v2389_v15, %v3932_v25  ;;  %v2392_v49 = vmul.f32 %v2389_v15, %v3938_v34  ;;  %v2393_v39 = vmul.f32 %v2389_v15, %v3941_v36  ;;  %v2396_v60 = vmul.f32 %v2389_v15, %v3963_v57 }
 0x3ed   : > { %v2551_v24 = vadd.f32 %v2550_v43, %v2538_v48  ;;  %v2391_v48 = vmul.f32 %v2389_v15, %v3935_v33  ;;  %v2397_v45 = vmul.f32 %v2389_v15, %v3972_v62  ;;  %v2399_v25 = vmul.f32 %v2389_v15, %v3982_v54 }
 0x3ee   : > { %v2400_v33 = vmul.f32 %v2389_v15, %v3991_v10  ;;  %v2402_v34 = vmul.f32 %v2390_v28, %v3741_v55 }
 0x3ef   : > { %v2552_v18 = vadd.f32 %v2551_v24, %v2539_v6  ;;  %v2394_v6 = vmul.f32 %v2389_v15, %v3953_v51  ;;  %v2395_v24 = vmul.f32 %v2389_v15, %v3950_v50  ;;  %v2403_v36 = vmul.f32 %v2391_v48, %v3741_v55 }
 0x3f0   : > { %v2404_v51 = vmul.f32 %v2392_v49, %v3741_v55  ;;  %v2405_v50 = vmul.f32 %v2393_v39, %v3726_v44  ;;  %v2409_v54 = vmul.f32 %v2397_v45, %v3728_v46 }
 0x3f1   : > { %v2554_v40 = vadd.f32 %v2553_v1, %v2552_v18  ;;  %v2398_v18 = vmul.f32 %v2389_v15, %v3969_v58  ;;  %v2401_v1 = vmul.f32 %v2389_v15, %v3987_v20  ;;  %v2406_v57 = vmul.f32 %v2394_v6, %v3726_v44 }
 0x3f2   : > { %v2407_v62 = vmul.f32 %v2395_v24, %v3726_v44  ;;  %v2408_v58 = vmul.f32 %v2396_v60, %v3728_v46 }
 0x3f3   : > { %v2555_v11 = vadd.f32 %v2554_v40, %v2541_v42  ;;  %v2410_v10 = vmul.f32 %v2398_v18, %v3728_v46 }
 0x3f5   : > { %v2556_v21 = vadd.f32 %v2555_v11, %v2542_v19 }
 0x3f7   : > { %v2558_v8 = vadd.f32 %v2557_v29, %v2556_v21 }
 0x3f9   : > { %2559 = vadd.xlane.f32.xlu1 %v2558_v8  ;;  %v2622_v8 = vpop.permute.xlu0 %2621 }
 0x40a   : > { %2616 = vperm.xlu1 %3214, %v2610_v31  }
 0x40e   : > { %2626 = vperm.xlu1 %3214, %v2612_v9  }
 0x412   : > { %2631 = vperm.xlu1 %3214, %v2613_v35  }
 0x416   : > { %2657 = vperm.xlu1 %3214, %v2647_v37  }
 0x41a   : > { %2667 = vperm.xlu1 %3214, %v2649_v32  }
 0x486   : > { %v2560_v7 = vpop.xlane.xlu1 %2559 }
 0x487   : > { %v2561_v13 = vrot.slane %v2560_v7, 4 }
 0x489   : > { %v2562_v47 = vadd.f32 %v2561_v13, %v2560_v7 }
 0x48a   : > { %v4112_v43 = vpop.permute.xlu1 %2616 }
 0x48b   : > { %v2563_v52 = vrot.slane %v2562_v47, 2 }
 0x48d   : > { %v2564_v12 = vadd.f32 %v2563_v52, %v2562_v47 }
 0x48e   : > { %v2627_v20 = vpop.permute.xlu1 %2626 }
 0x48f   : > { %v2565_v38 = vrot.slane %v2564_v12, 1 }
 0x491   : > { %v2566_v23 = vadd.f32 %v2565_v38, %v2564_v12 }
 0x492   : > { %v2632_v9 = vpop.permute.xlu1 %2631 }
 0x493   : > { %3191 = vpush %v2566_v23  ;;  %v2653_v23 = vpop.permute.xlu0 %2652 }
 0x4c4   : > { %s3192_s26 = spop %3191 }
 0x4c5   : > { %s2568_s27 = smul.f32 0.00024414063, %s3192_s26 }
 0x4c7   : > { %s2569_s28 = sadd.f32 1e-05, %s2568_s27 }
 0x4c9   : > { %v2570_v0 = vstv %s2569_s28 }
 0x4ca   : > { %3222 = vrsqrt.f32 %v2570_v0  ;;  %v4251_v0 = vld [vmem:[#allocation2_spill] sm:$0xff] }
 0x4cb   : > { %v2412_v15 = vmul.f32 %v2400_v33, %v4251_v0 }
 0x4d4   : > { %v3223_v16 = vpop.eup %3222 }
 0x4d5   : > { %3193 = vpush %v3223_v16  ;;  %v2411_v16 = vmul.f32 %v2399_v25, %v4251_v0 }
 0x506   : > { %s3194_s29 = spop %3193 }
 0x507   : > { %v2573_v42 = vstv %s3194_s29 }
 0x508   : > { %v2574_v40 = vmul.f32 %v2573_v42, %v4019_v14  ;;  %v2575_v30 = vmul.f32 %v2573_v42, %v4022_v5  ;;  %v2576_v55 = vmul.f32 %v2573_v42, %v4025_v27  ;;  %v2577_v19 = vmul.f32 %v2573_v42, %v4028_v61 }
 0x509   : > { %v2578_v11 = vmul.f32 %v2573_v42, %v4040_v4  ;;  %v2579_v44 = vmul.f32 %v2573_v42, %v4037_v2  ;;  %v2580_v21 = vmul.f32 %v2573_v42, %v4050_v22  ;;  %v2581_v29 = vmul.f32 %v2573_v42, %v4059_v63 }
 0x50a   : > { %v2582_v46 = vmul.f32 %v2573_v42, %v4056_v59  ;;  %v2583_v31 = vmul.f32 %v2573_v42, %v4069_v41  ;;  %v2584_v14 = vmul.f32 %v2573_v42, %v4078_v17  ;;  %v2585_v5 = vmul.f32 %v2573_v42, %v4074_v26  ;;  %v4250_v26 = vld [vmem:[#allocation3_spill] sm:$0xff] }
 0x50b   : > { %v2586_v27 = vmul.f32 %v2574_v40, %v3737_v53  ;;  %v2587_v61 = vmul.f32 %v2575_v30, %v3737_v53  ;;  %v2588_v4 = vmul.f32 %v2576_v55, %v3737_v53  ;;  %v2589_v2 = vmul.f32 %v2577_v19, %v3763_v3 }
 0x50c   : > { %v2590_v22 = vmul.f32 %v2578_v11, %v3763_v3  ;;  %v2591_v63 = vmul.f32 %v2579_v44, %v3763_v3  ;;  %v2592_v59 = vmul.f32 %v3831_v56, %v2580_v21  ;;  %v2593_v41 = vmul.f32 %v3831_v56, %v2581_v29 }
 0x50d   : > { %v2594_v17 = vmul.f32 %v3831_v56, %v2582_v46  ;;  %v2595_v35 = vmul.f32 %v4250_v26, %v2583_v31  ;;  %v2596_v37 = vmul.f32 %v4250_v26, %v2584_v14  ;;  %v2597_v32 = vmul.f32 %v4250_v26, %v2585_v5 }
 0x50e   : > { %v2598_v53 = vadd.f32 %v2586_v27, %v2402_v34  ;;  %v2599_v7 = vadd.f32 %v2587_v61, %v2403_v36  ;;  %v2600_v13 = vadd.f32 %v2588_v4, %v2404_v51  ;;  %v2601_v47 = vadd.f32 %v2589_v2, %v2405_v50  ;;  %v2658_v34 = vpop.permute.xlu1 %2657 }
 0x50f   : > { %v2602_v52 = vadd.f32 %v2590_v22, %v2406_v57  ;;  %v2603_v12 = vadd.f32 %v2591_v63, %v2407_v62  ;;  %v2604_v3 = vadd.f32 %v2592_v59, %v2408_v58  ;;  %v2605_v38 = vadd.f32 %v2593_v41, %v2409_v54 }
 0x510   : > { %v2413_v56 = vmul.f32 %v2401_v1, %v4251_v0  ;;  %v2606_v28 = vadd.f32 %v2594_v17, %v2410_v10  ;;  %v2634_v48 = vmul.f32 %v4112_v43, %v2598_v53  ;;  %v2635_v49 = vmul.f32 %v4112_v43, %v2599_v7 }
 0x511   : > { %v2636_v39 = vmul.f32 %v4112_v43, %v2600_v13  ;;  %v2637_v6 = vmul.f32 %v2622_v8, %v2601_v47  ;;  %v2607_v24 = vadd.f32 %v2595_v35, %v2411_v16  ;;  %v2608_v60 = vadd.f32 %v2596_v37, %v2412_v15  ;;  %v2663_v43 = vpop.permute.xlu0 %2662 }
 0x512   : > { %v2638_v45 = vmul.f32 %v2622_v8, %v2602_v52  ;;  %v2639_v18 = vmul.f32 %v2622_v8, %v2603_v12  ;;  %v2609_v36 = vadd.f32 %v2597_v32, %v2413_v56  ;;  %v2640_v51 = vmul.f32 %v2627_v20, %v2604_v3  ;;  %v2668_v21 = vpop.permute.xlu1 %2667 }
 0x513   : > { %v2641_v25 = vmul.f32 %v2627_v20, %v2605_v38  ;;  %v4163_v50 = vadd.f32 %v2653_v23, %v2634_v48  ;;  %v4165_v33 = vadd.f32 %v2653_v23, %v2635_v49  ;;  %v4167_v1 = vadd.f32 %v2653_v23, %v2636_v39 }
 0x514   : > { %v4169_v57 = vadd.f32 %v2658_v34, %v2637_v6  ;;  %v2642_v62 = vmul.f32 %v2627_v20, %v2606_v28  ;;  %v4171_v58 = vadd.f32 %v2658_v34, %v2638_v45  ;;  %v2643_v54 = vmul.f32 %v2632_v9, %v2607_v24 }
 0x515   : > { %v2644_v10 = vmul.f32 %v2632_v9, %v2608_v60  ;;  %v4173_v42 = vadd.f32 %v2658_v34, %v2639_v18  ;;  %v4175_v40 = vadd.f32 %v2663_v43, %v2640_v51  ;;  %v2952_v30 = vmul.f32 -1.442695, %v4163_v50 }
 0x516   : > { %v2953_v55 = vmul.f32 -1.442695, %v4165_v33  ;;  %v2954_v19 = vmul.f32 -1.442695, %v4167_v1  ;;  %v2645_v11 = vmul.f32 %v2632_v9, %v2609_v36  ;;  %v4180_v44 = vadd.f32 %v2663_v43, %v2641_v25 }
 0x517   : > { %v2955_v20 = vmul.f32 -1.442695, %v4169_v57  ;;  %v4183_v29 = vadd.f32 %v2663_v43, %v2642_v62  ;;  %3224 = vpow2.f32 %v2952_v30  ;;  %v2956_v8 = vmul.f32 -1.442695, %v4171_v58 }
 0x518   : > { %v4186_v46 = vadd.f32 %v2668_v21, %v2643_v54  ;;  %3226 = vpow2.f32 %v2953_v55  ;;  %v2957_v31 = vmul.f32 -1.442695, %v4173_v42  ;;  %v4189_v14 = vadd.f32 %v2668_v21, %v2644_v10 }
 0x519   : > { %3228 = vpow2.f32 %v2954_v19  ;;  %v2958_v5 = vmul.f32 -1.442695, %v4175_v40  ;;  %v4192_v27 = vadd.f32 %v2668_v21, %v2645_v11  ;;  %v2959_v61 = vmul.f32 -1.442695, %v4180_v44 }
 0x51a   : > { %3230 = vpow2.f32 %v2955_v20  ;;  %v2960_v4 = vmul.f32 -1.442695, %v4183_v29  ;;  %v2961_v2 = vmul.f32 -1.442695, %v4186_v46  ;;  %v2962_v22 = vmul.f32 -1.442695, %v4189_v14 }
 0x51b   : > { %3232 = vpow2.f32 %v2956_v8  ;;  %v2963_v63 = vmul.f32 -1.442695, %v4192_v27 }
 0x51c   : > { %3234 = vpow2.f32 %v2957_v31 }
 0x51d   : > { %3236 = vpow2.f32 %v2958_v5 }
 0x51e   : > { %3238 = vpow2.f32 %v2959_v61 }
 0x51f   : > { %3240 = vpow2.f32 %v2960_v4 }
 0x520   : > { %3242 = vpow2.f32 %v2961_v2 }
 0x521   : > { %v3225_v59 = vpop.eup %3224  ;;  %3244 = vpow2.f32 %v2962_v22 }
 0x522   : > { %v3227_v41 = vpop.eup %3226  ;;  %3246 = vpow2.f32 %v2963_v63  ;;  %v2718_v9 = vadd.f32 1.0, %v3225_v59 }
 0x523   : > { %v3229_v17 = vpop.eup %3228  ;;  %v2719_v26 = vadd.f32 1.0, %v3227_v41 }
 0x524   : > { %v3231_v35 = vpop.eup %3230  ;;  %v2720_v37 = vadd.f32 1.0, %v3229_v17  ;;  %3248 = vrcp.f32 %v2718_v9 }
 0x525   : > { %v3233_v32 = vpop.eup %3232  ;;  %v2721_v53 = vadd.f32 1.0, %v3231_v35  ;;  %3250 = vrcp.f32 %v2719_v26 }
 0x526   : > { %v3235_v7 = vpop.eup %3234  ;;  %v2722_v13 = vadd.f32 1.0, %v3233_v32  ;;  %3252 = vrcp.f32 %v2720_v37 }
 0x527   : > { %v3237_v47 = vpop.eup %3236  ;;  %v2723_v52 = vadd.f32 1.0, %v3235_v7  ;;  %3254 = vrcp.f32 %v2721_v53 }
 0x528   : > { %v3239_v12 = vpop.eup %3238  ;;  %v2724_v3 = vadd.f32 1.0, %v3237_v47  ;;  %3256 = vrcp.f32 %v2722_v13 }
 0x529   : > { %v3241_v38 = vpop.eup %3240  ;;  %v2725_v23 = vadd.f32 1.0, %v3239_v12  ;;  %3258 = vrcp.f32 %v2723_v52 }
 0x52a   : > { %v3243_v0 = vpop.eup %3242  ;;  %v2726_v16 = vadd.f32 1.0, %v3241_v38  ;;  %3260 = vrcp.f32 %v2724_v3 }
 0x52b   : > { %v3245_v15 = vpop.eup %3244  ;;  %v2727_v56 = vadd.f32 1.0, %v3243_v0  ;;  %3262 = vrcp.f32 %v2725_v23 }
 0x52c   : > { %v3247_v28 = vpop.eup %3246  ;;  %v2728_v48 = vadd.f32 1.0, %v3245_v15  ;;  %3264 = vrcp.f32 %v2726_v16 }
 0x52d   : > { %v2729_v49 = vadd.f32 1.0, %v3247_v28  ;;  %3266 = vrcp.f32 %v2727_v56 }
 0x52e   : > { %v3249_v39 = vpop.eup %3248  ;;  %3268 = vrcp.f32 %v2728_v48 }
 0x52f   : > { %v3251_v6 = vpop.eup %3250  ;;  %3270 = vrcp.f32 %v2729_v49  ;;  %v2754_v24 = vmul.f32 %v3249_v39, %v4163_v50 }
 0x530   : > { %v3253_v60 = vpop.eup %3252  ;;  %v2755_v45 = vmul.f32 %v3251_v6, %v4165_v33 }
 0x531   : > { %v3255_v18 = vpop.eup %3254  ;;  %v2756_v34 = vmul.f32 %v3253_v60, %v4167_v1  ;;  %2766 = vst [vmem:[%s4203_s10] sm:$0xff] %v2754_v24 }
 0x532   : > { %v3257_v36 = vpop.eup %3256  ;;  %v2757_v51 = vmul.f32 %v3255_v18, %v4169_v57  ;;  %2767 = vst [vmem:[%s4203_s10 + $0x8] sm:$0xff] %v2755_v45 }
 0x533   : > { %v3259_v25 = vpop.eup %3258  ;;  %v2758_v62 = vmul.f32 %v3257_v36, %v4171_v58  ;;  %2768 = vst.msk [vmem:[%s4203_s10 + $0x10] sm:$0xff] %vm2298_vm1, %v2756_v34 }
 0x534   : > { %v3261_v50 = vpop.eup %3260  ;;  %v2759_v43 = vmul.f32 %v3259_v25, %v4173_v42  ;;  %2769 = vst [vmem:[%s4203_s10 + $0x18] sm:$0xff] %v2757_v51 }
 0x535   : > { %v3263_v33 = vpop.eup %3262  ;;  %v2760_v1 = vmul.f32 %v3261_v50, %v4175_v40  ;;  %2770 = vst [vmem:[%s4203_s10 + $0x20] sm:$0xff] %v2758_v62 }
 0x536   : > { %v3265_v57 = vpop.eup %3264  ;;  %v2761_v54 = vmul.f32 %v3263_v33, %v4180_v44  ;;  %2771 = vst.msk [vmem:[%s4203_s10 + $0x28] sm:$0xff] %vm2298_vm1, %v2759_v43 }
 0x537   : > { %v3267_v58 = vpop.eup %3266  ;;  %v2762_v10 = vmul.f32 %v3265_v57, %v4183_v29  ;;  %2772 = vst [vmem:[%s4203_s10 + $0x30] sm:$0xff] %v2760_v1 }
 0x538   : > { %v3269_v30 = vpop.eup %3268  ;;  %v2763_v42 = vmul.f32 %v3267_v58, %v4186_v46  ;;  %2773 = vst [vmem:[%s4203_s10 + $0x38] sm:$0xff] %v2761_v54 }
 0x539   : > { %v3271_v55 = vpop.eup %3270  ;;  %v2764_v19 = vmul.f32 %v3269_v30, %v4189_v14  ;;  %2774 = vst.msk [vmem:[%s4203_s10 + $0x40] sm:$0xff] %vm2298_vm1, %v2762_v10 }
 0x53a   : > { %v2765_v40 = vmul.f32 %v3271_v55, %v4192_v27  ;;  %2775 = vst [vmem:[%s4203_s10 + $0x48] sm:$0xff] %v2763_v42 }
 0x53b   : > { %2776 = vst [vmem:[%s4203_s10 + $0x50] sm:$0xff] %v2764_v19 }
 0x53c   : > { %2777 = vst.msk [vmem:[%s4203_s10 + $0x58] sm:$0xff] %vm2298_vm1, %v2765_v40 }
 0x53d PF: > { %s17_s24 = sadd.s32 1, %s3278_s24  }
 0x53e   : > { %p14_p4 = scmp.ge.s32.totalorder %s17_s24, 4  }
 0x540   :  { %16 = sbr.rel (!%p14_p4) target bundleno = 1 (0x1), region = 86 }

</bundles_post_ra>
